<compile_context>
chip_gen: v5e
topology: v5e:2x2
jax: 0.10.0
libtpu: 0.0.40
codegen_flags: <defaults>
</compile_context>

<pallas_src>
import functools

import jax
import jax.numpy as jnp
from jax import lax
from jax.experimental import pallas as pl
from jax.experimental.pallas import tpu as pltpu


# --------------------------------------------------------------------------- #
# Hardware-aware knobs
# --------------------------------------------------------------------------- #

@functools.lru_cache(maxsize=1)
def _vmem_limit_bytes():
    """~70% of physical VMEM: ~45 MiB on v7x, ~90 MiB on v5e/v6e."""
    try:
        cap = int(getattr(pltpu.get_tpu_info(), "vmem_capacity_bytes"))
    except Exception:
        cap = 0
    if cap <= 0:
        return 48 * 1024 * 1024          # conservative fallback, safe everywhere
    return max(32 * 1024 * 1024, int(cap * 0.70))


def _pick_tile(dim, target, aligns=(256, 128, 16, 8)):
    """Largest tile <= target dividing `dim`, preferring MXU-friendly alignments
    (256 for v6e/v7x, 128 for v5e, 16 = bf16 sublane packing)."""
    if dim <= target:
        return dim
    for align in aligns:
        t = (target // align) * align
        while t >= align:
            if dim % t == 0:
                return t
            t -= align
    return dim


def _fused_fits_vmem(N, C, limit):
    """Rough per-grid-step VMEM footprint of the fully fused kernel."""
    weights = 2 * 2 * (3 * C * C + C * C) + 2 * 4 * C      # bf16 weights + f32 bias (x2 bufs)
    io = 2 * 2 * N * C + 2 * 4 * N * C                     # x bf16 + out f32, double-buffered
    scratch = 2 * N * 3 * C + 4 * N * C                    # qkv_scr bf16 + att_scr f32
    live = 3 * 4 * N * N + 6 * 4 * N * C                   # scores/probs + misc f32 temporaries
    return (weights + io + scratch + live) < 0.8 * limit


# --------------------------------------------------------------------------- #
# Kernels
# --------------------------------------------------------------------------- #

def _mha_into_scratch(qkv_ref, att_scr, num_heads):
    """Multi-head softmax(q k^T) v from one (N, 3C) bf16 qkv ref into an (N, C)
    f32 VMEM scratch.  The softmax scale is already folded into q."""
    N, C = att_scr.shape
    D = C // num_heads

    # 128-aligned slices of the single qkv buffer (one DMA pipeline, free slices).
    q_all = qkv_ref[:, :C]
    k_all = qkv_ref[:, C:2 * C]
    v_all = qkv_ref[:, 2 * C:3 * C]

    for h in range(num_heads):                      # static unroll over heads
        lo = h * D
        q = q_all[:, lo:lo + D]
        k = k_all[:, lo:lo + D]
        v = v_all[:, lo:lo + D]
        # q @ k^T as a last-dim contraction (no in-kernel transpose).
        s = lax.dot_general(q, k, (((1,), (1,)), ((), ())),
                            preferred_element_type=jnp.float32)        # (N, N) f32
        s = s - jnp.max(s, axis=-1, keepdims=True)                     # f32 stats
        p = jnp.exp(s)
        # approx reciprocal: EUP path, ~2^-12 rel error in the softmax denom.
        p = p * pl.reciprocal(jnp.sum(p, axis=-1, keepdims=True), approx=True)
        # Per-head store at a static lane offset: bounds live ranges, avoids the
        # cross-lane concatenate; one dense load later feeds the projection.
        att_scr[:, lo:lo + D] = jnp.dot(p.astype(jnp.bfloat16), v,
                                        preferred_element_type=jnp.float32)
    # TODO(synk): flash-style online-softmax KV/Q tiling for long sequences
    # (N >~ 1-2K) to bound the v7x (64 MiB VMEM) footprint and expose a parallel
    # q-tile axis that feeds the second TensorCore when B == 1.


def _proj_epilogue(att_scr, wproj_ref, bproj_ref, o_ref):
    """Output projection fused into the attention kernel: resident-weight matmul
    + bias, then a single lane-dense (N, C) store."""
    o = jnp.dot(att_scr[...].astype(jnp.bfloat16), wproj_ref[...],
                preferred_element_type=jnp.float32)
    o_ref[...] = (o + bproj_ref[...]).astype(o_ref.dtype)


def _attn_fused_kernel(x_ref, wqkv_ref, wproj_ref, bproj_ref, o_ref,
                       qkv_scr, att_scr, *, num_heads):
    """Fully fused per-batch-row kernel: qkv projection -> MHA -> out projection.
    x_ref (N, C) bf16; weights resident bf16 (scale folded into q columns);
    output (N, C) f32."""
    qkv_scr[...] = jnp.dot(x_ref[...], wqkv_ref[...],
                           preferred_element_type=jnp.float32).astype(jnp.bfloat16)
    _mha_into_scratch(qkv_scr, att_scr, num_heads)
    _proj_epilogue(att_scr, wproj_ref, bproj_ref, o_ref)


def _attn_proj_kernel(qkv_ref, wproj_ref, bproj_ref, o_ref, att_scr, *, num_heads):
    """Staged-path kernel: MHA over a precomputed (N, 3C) qkv row + fused proj."""
    _mha_into_scratch(qkv_ref, att_scr, num_heads)
    _proj_epilogue(att_scr, wproj_ref, bproj_ref, o_ref)


def _matmul_kernel(x_ref, w_ref, o_ref, acc_ref):
    """No-bias tiled matmul; k (reduction) is the innermost grid axis."""
    k = pl.program_id(2)

    @pl.when(k == 0)
    def _():
        acc_ref[...] = jnp.zeros_like(acc_ref)

    acc_ref[...] += jnp.dot(x_ref[...], w_ref[...],
                            preferred_element_type=jnp.float32)

    @pl.when(k == pl.num_programs(2) - 1)
    def _():
        o_ref[...] = acc_ref[...].astype(o_ref.dtype)


# --------------------------------------------------------------------------- #
# Host wrappers
# --------------------------------------------------------------------------- #

def _matmul(x2d, w, *, out_dtype):
    """(M, K) @ (K, Nout) tiled bf16 MXU matmul with an f32 accumulator
    (no bias — the only remaining standalone linear is the bias-free qkv)."""
    M, K = x2d.shape
    K2, Nout = w.shape
    assert K == K2

    tm = _pick_tile(M, 512, (256, 128, 16, 8))
    tk = _pick_tile(K, 1024, (256, 128))
    tn = _pick_tile(Nout, 1024, (256, 128))
    grid = (M // tm, Nout // tn, K // tk)

    return pl.pallas_call(
        _matmul_kernel,
        out_shape=jax.ShapeDtypeStruct((M, Nout), out_dtype),
        grid=grid,
        in_specs=[pl.BlockSpec((tm, tk), lambda i, j, k: (i, k)),
                  pl.BlockSpec((tk, tn), lambda i, j, k: (k, j))],
        out_specs=pl.BlockSpec((tm, tn), lambda i, j, k: (i, j)),
        scratch_shapes=[pltpu.VMEM((tm, tn), jnp.float32)],
        compiler_params=pltpu.CompilerParams(
            dimension_semantics=("parallel", "parallel", "arbitrary"),
            vmem_limit_bytes=_vmem_limit_bytes()),
    )(x2d, w)


def _attention_fused(x_bf, wqkv_bf, wproj_bf, bproj, num_heads):
    """Fully fused path: one grid step per batch row; weights stay resident."""
    B, N, C = x_bf.shape
    row = (pl.Squeezed(), N, C)
    return pl.pallas_call(
        functools.partial(_attn_fused_kernel, num_heads=num_heads),
        out_shape=jax.ShapeDtypeStruct((B, N, C), jnp.float32),
        grid=(B,),
        in_specs=[pl.BlockSpec(row, lambda b: (b, 0, 0)),
                  pl.BlockSpec((C, 3 * C), lambda b: (0, 0)),   # resident w_qkv
                  pl.BlockSpec((C, C), lambda b: (0, 0)),       # resident w_proj
                  pl.BlockSpec((1, C), lambda b: (0, 0))],      # resident b_proj
        out_specs=pl.BlockSpec(row, lambda b: (b, 0, 0)),
        scratch_shapes=[pltpu.VMEM((N, 3 * C), jnp.bfloat16),
                        pltpu.VMEM((N, C), jnp.float32)],
        compiler_params=pltpu.CompilerParams(
            dimension_semantics=("parallel",),
            vmem_limit_bytes=_vmem_limit_bytes()),
    )(x_bf, wqkv_bf, wproj_bf, bproj)


def _attention_staged(x_bf, wqkv_bf, wproj_bf, bproj, num_heads):
    """Fallback for footprints too big for the fully fused kernel: tiled qkv
    matmul, then per-row attention with the output projection still fused."""
    B, N, C = x_bf.shape
    qkv = _matmul(x_bf.reshape(B * N, C), wqkv_bf, out_dtype=jnp.bfloat16)
    qkv = qkv.reshape(B, N, 3 * C)                 # free view, no transpose
    return pl.pallas_call(
        functools.partial(_attn_proj_kernel, num_heads=num_heads),
        out_shape=jax.ShapeDtypeStruct((B, N, C), jnp.float32),
        grid=(B,),
        in_specs=[pl.BlockSpec((pl.Squeezed(), N, 3 * C), lambda b: (b, 0, 0)),
                  pl.BlockSpec((C, C), lambda b: (0, 0)),       # resident w_proj
                  pl.BlockSpec((1, C), lambda b: (0, 0))],      # resident b_proj
        out_specs=pl.BlockSpec((pl.Squeezed(), N, C), lambda b: (b, 0, 0)),
        scratch_shapes=[pltpu.VMEM((N, C), jnp.float32)],
        compiler_params=pltpu.CompilerParams(
            dimension_semantics=("parallel",),
            vmem_limit_bytes=_vmem_limit_bytes()),
    )(qkv, wproj_bf, bproj)


def attention_forward(x, params, num_heads, fuse_qkv=None):
    """Pallas implementation of Attention.forward (inference).

    x: (B, N, C) float32.
    params: w_qkv (C, 3C), w_proj (C, C), b_proj (C,)  — weights transposed vs.
    PyTorch's (out, in) nn.Linear layout.  qkv_bias=False, qk_norm=False;
    attn_drop / proj_drop are inference no-ops.
    """
    B, N, C = x.shape
    H = num_heads
    assert C % H == 0
    D = C // H
    scale = float(D) ** -0.5

    # Fold the softmax scale into the q columns of w_qkv (f32, host side), so the
    # kernel does no bf16 elementwise scaling (v5e has no bf16 VPU/EUP path).
    w_qkv = params["w_qkv"].astype(jnp.float32)
    w_qkv = w_qkv.at[:, :C].multiply(scale)

    wqkv_bf = w_qkv.astype(jnp.bfloat16)
    wproj_bf = params["w_proj"].astype(jnp.bfloat16)
    bproj = params["b_proj"].astype(jnp.float32).reshape(1, C)
    x_bf = x.astype(jnp.bfloat16)

    if fuse_qkv is None:
        fuse_qkv = _fused_fits_vmem(N, C, _vmem_limit_bytes())

    if fuse_qkv:
        return _attention_fused(x_bf, wqkv_bf, wproj_bf, bproj, H)
    return _attention_staged(x_bf, wqkv_bf, wproj_bf, bproj, H)


attention_forward_jit = jax.jit(attention_forward,
                                static_argnames=("num_heads", "fuse_qkv"))


# Pure-JAX f32 reference for the correctness check.
def attention_reference(x, params, num_heads):
    B, N, C = x.shape
    H = num_heads
    D = C // H
    scale = float(D) ** -0.5
    qkv = x @ params["w_qkv"]
    qkv = qkv.reshape(B, N, 3, H, D).transpose(2, 0, 3, 1, 4)
    q, k, v = qkv[0], qkv[1], qkv[2]
    s = jnp.einsum("bhnd,bhmd->bhnm", q, k) * scale
    p = jax.nn.softmax(s, axis=-1)
    o = jnp.einsum("bhnm,bhmd->bhnd", p, v)
    o = o.transpose(0, 2, 1, 3).reshape(B, N, C)
    return o @ params["w_proj"] + params["b_proj"]


# ---------------------------------- main ----------------------------------- #

if __name__ == "__main__":
    B, N, C = 2, 16, 128          # C multiple of 128 -> lane-aligned q/k/v slices
    num_heads = 8                 # head_dim = 16

    key = jax.random.PRNGKey(0)
    kx, kw1, kw2, kb = jax.random.split(key, 4)

    x = jax.random.normal(kx, (B, N, C), dtype=jnp.float32)
    params = {
        "w_qkv": jax.random.normal(kw1, (C, 3 * C), dtype=jnp.float32) * (C ** -0.5),
        "w_proj": jax.random.normal(kw2, (C, C), dtype=jnp.float32) * (C ** -0.5),
        "b_proj": jax.random.normal(kb, (C,), dtype=jnp.float32) * 0.01,
    }

    ref = attention_reference(x, params, num_heads)

    # Default path (fully fused: qkv proj + MHA + out proj in one kernel).
    out = jax.block_until_ready(attention_forward_jit(x, params, num_heads=num_heads))
    assert out.shape == (B, N, C)
    err = float(jnp.max(jnp.abs(out - ref)))
    # bf16 MXU operands (f32 accumulation / f32 softmax stats, approx reciprocal
    # in the softmax denominator) vs. the pure-f32 reference.
    assert err < 6e-2, f"fused path mismatch vs reference: max abs err {err}"

    # Staged fallback path (tiled qkv matmul + attention-with-fused-projection).
    out_staged = jax.block_until_ready(
        attention_forward_jit(x, params, num_heads=num_heads, fuse_qkv=False))
    err_staged = float(jnp.max(jnp.abs(out_staged - ref)))
    assert err_staged < 6e-2, f"staged path mismatch vs reference: max abs err {err_staged}"

    print("KERNEL_OK")
</pallas_src>

<mosaic_0001>
module attributes {stable_mosaic.version = 11 : i64} {
  func.func @_attn_fused_kernel(%arg0: i32, %arg1: memref<1x16x128xbf16, #tpu.memory_space<vmem>>, %arg2: memref<128x384xbf16, #tpu.memory_space<vmem>>, %arg3: memref<128x128xbf16, #tpu.memory_space<vmem>>, %arg4: memref<1x128xf32, #tpu.memory_space<vmem>>, %arg5: memref<1x16x128xf32, #tpu.memory_space<vmem>>, %arg6: memref<16x384xbf16, #tpu.memory_space<vmem>>, %arg7: memref<16x128xf32, #tpu.memory_space<vmem>>) attributes {dimension_semantics = [#tpu.dimension_semantics<parallel>], iteration_bounds = array<i64: 2>, scalar_prefetch = 0 : i64, scratch_operands = 2 : i64, tpu.core_type = #tpu.core_type<tc>, window_params = [{transform_indices = @transform_0, window_bounds = array<i64: 1, 16, 128>}, {pipeline_mode = #tpu.pipeline_mode<synchronous>, transform_indices = @transform_1, window_bounds = array<i64: 128, 384>}, {pipeline_mode = #tpu.pipeline_mode<synchronous>, transform_indices = @transform_2, window_bounds = array<i64: 128, 128>}, {pipeline_mode = #tpu.pipeline_mode<synchronous>, transform_indices = @transform_3, window_bounds = array<i64: 1, 128>}, {transform_indices = @transform_4, window_bounds = array<i64: 1, 16, 128>}]} {
    %c0 = arith.constant 0 : index
    %c0_0 = arith.constant 0 : index
    %c0_1 = arith.constant 0 : index
    %0 = vector.load %arg1[%c0, %c0_0, %c0_1] : memref<1x16x128xbf16, #tpu.memory_space<vmem>>, vector<1x16x128xbf16>
    %1 = vector.shape_cast %0 : vector<1x16x128xbf16> to vector<16x128xbf16>
    %c0_2 = arith.constant 0 : index
    %c0_3 = arith.constant 0 : index
    %2 = vector.load %arg2[%c0_2, %c0_3] : memref<128x384xbf16, #tpu.memory_space<vmem>>, vector<128x384xbf16>
    %cst = arith.constant dense<0.000000e+00> : vector<16x384xf32>
    %3 = tpu.matmul %1, %2, %cst {dimension_numbers = #tpu.dot_dimension_numbers<[1], [0], [0], [1], [0, 0, 1, 1], [], []>} : vector<16x128xbf16>, vector<128x384xbf16>, vector<16x384xf32> -> vector<16x384xf32>
    %4 = arith.truncf %3 : vector<16x384xf32> to vector<16x384xbf16>
    %c0_4 = arith.constant 0 : index
    %c0_5 = arith.constant 0 : index
    %5 = vector.load %arg6[%c0_4, %c0_5] : memref<16x384xbf16, #tpu.memory_space<vmem>>, vector<16x384xbf16>
    tpu.vector_store %arg6[%c0_4, %c0_5], %4 {strides = array<i32>} : memref<16x384xbf16, #tpu.memory_space<vmem>>, vector<16x384xbf16>,
    %c0_6 = arith.constant 0 : index
    %c0_7 = arith.constant 0 : index
    %6 = vector.load %arg6[%c0_6, %c0_7] : memref<16x384xbf16, #tpu.memory_space<vmem>>, vector<16x128xbf16>
    %c0_8 = arith.constant 0 : index
    %c128 = arith.constant 128 : index
    %7 = vector.load %arg6[%c0_8, %c128] : memref<16x384xbf16, #tpu.memory_space<vmem>>, vector<16x128xbf16>
    %c0_9 = arith.constant 0 : index
    %c256 = arith.constant 256 : index
    %8 = vector.load %arg6[%c0_9, %c256] : memref<16x384xbf16, #tpu.memory_space<vmem>>, vector<16x128xbf16>
    %9 = vector.extract_strided_slice %6 {offsets = [0, 0], sizes = [16, 16], strides = [1, 1]} : vector<16x128xbf16> to vector<16x16xbf16>
    %10 = vector.extract_strided_slice %7 {offsets = [0, 0], sizes = [16, 16], strides = [1, 1]} : vector<16x128xbf16> to vector<16x16xbf16>
    %11 = vector.extract_strided_slice %8 {offsets = [0, 0], sizes = [16, 16], strides = [1, 1]} : vector<16x128xbf16> to vector<16x16xbf16>
    %cst_10 = arith.constant dense<0.000000e+00> : vector<16x16xf32>
    %12 = tpu.matmul %9, %10, %cst_10 {dimension_numbers = #tpu.dot_dimension_numbers<[1], [1], [0], [0], [0, 0, 1, 0], [], []>} : vector<16x16xbf16>, vector<16x16xbf16>, vector<16x16xf32> -> vector<16x16xf32>
    %cst_11 = arith.constant dense<0xFF800000> : vector<16xf32>
    %13 = vector.multi_reduction <maximumf>, %12, %cst_11 [1] : vector<16x16xf32> to vector<16xf32>
    %14 = vector.shape_cast %13 : vector<16xf32> to vector<16x1xf32>
    %15 = vector.broadcast %14 : vector<16x1xf32> to vector<16x16xf32>
    %16 = arith.subf %12, %15 : vector<16x16xf32>
    %17 = math.exp %16 : vector<16x16xf32>
    %cst_12 = arith.constant dense<0.000000e+00> : vector<16xf32>
    %18 = vector.multi_reduction <add>, %17, %cst_12 [1] : vector<16x16xf32> to vector<16xf32>
    %19 = vector.shape_cast %18 : vector<16xf32> to vector<16x1xf32>
    %20 = tpu.reciprocal %19 {approx = true} : vector<16x1xf32> -> vector<16x1xf32>
    %21 = vector.broadcast %20 : vector<16x1xf32> to vector<16x16xf32>
    %22 = arith.mulf %17, %21 : vector<16x16xf32>
    %23 = arith.truncf %22 : vector<16x16xf32> to vector<16x16xbf16>
    %cst_13 = arith.constant dense<0.000000e+00> : vector<16x16xf32>
    %24 = tpu.matmul %23, %11, %cst_13 {dimension_numbers = #tpu.dot_dimension_numbers<[1], [0], [0], [1], [0, 0, 1, 1], [], []>} : vector<16x16xbf16>, vector<16x16xbf16>, vector<16x16xf32> -> vector<16x16xf32>
    %c0_14 = arith.constant 0 : index
    %c0_15 = arith.constant 0 : index
    %25 = vector.load %arg7[%c0_14, %c0_15] : memref<16x128xf32, #tpu.memory_space<vmem>>, vector<16x16xf32>
    tpu.vector_store %arg7[%c0_14, %c0_15], %24 {strides = array<i32>} : memref<16x128xf32, #tpu.memory_space<vmem>>, vector<16x16xf32>,
    %26 = vector.extract_strided_slice %6 {offsets = [0, 16], sizes = [16, 16], strides = [1, 1]} : vector<16x128xbf16> to vector<16x16xbf16>
    %27 = vector.extract_strided_slice %7 {offsets = [0, 16], sizes = [16, 16], strides = [1, 1]} : vector<16x128xbf16> to vector<16x16xbf16>
    %28 = vector.extract_strided_slice %8 {offsets = [0, 16], sizes = [16, 16], strides = [1, 1]} : vector<16x128xbf16> to vector<16x16xbf16>
    %cst_16 = arith.constant dense<0.000000e+00> : vector<16x16xf32>
    %29 = tpu.matmul %26, %27, %cst_16 {dimension_numbers = #tpu.dot_dimension_numbers<[1], [1], [0], [0], [0, 0, 1, 0], [], []>} : vector<16x16xbf16>, vector<16x16xbf16>, vector<16x16xf32> -> vector<16x16xf32>
    %cst_17 = arith.constant dense<0xFF800000> : vector<16xf32>
    %30 = vector.multi_reduction <maximumf>, %29, %cst_17 [1] : vector<16x16xf32> to vector<16xf32>
    %31 = vector.shape_cast %30 : vector<16xf32> to vector<16x1xf32>
    %32 = vector.broadcast %31 : vector<16x1xf32> to vector<16x16xf32>
    %33 = arith.subf %29, %32 : vector<16x16xf32>
    %34 = math.exp %33 : vector<16x16xf32>
    %cst_18 = arith.constant dense<0.000000e+00> : vector<16xf32>
    %35 = vector.multi_reduction <add>, %34, %cst_18 [1] : vector<16x16xf32> to vector<16xf32>
    %36 = vector.shape_cast %35 : vector<16xf32> to vector<16x1xf32>
    %37 = tpu.reciprocal %36 {approx = true} : vector<16x1xf32> -> vector<16x1xf32>
    %38 = vector.broadcast %37 : vector<16x1xf32> to vector<16x16xf32>
    %39 = arith.mulf %34, %38 : vector<16x16xf32>
    %40 = arith.truncf %39 : vector<16x16xf32> to vector<16x16xbf16>
    %cst_19 = arith.constant dense<0.000000e+00> : vector<16x16xf32>
    %41 = tpu.matmul %40, %28, %cst_19 {dimension_numbers = #tpu.dot_dimension_numbers<[1], [0], [0], [1], [0, 0, 1, 1], [], []>} : vector<16x16xbf16>, vector<16x16xbf16>, vector<16x16xf32> -> vector<16x16xf32>
    %c0_20 = arith.constant 0 : index
    %c16 = arith.constant 16 : index
    %42 = vector.load %arg7[%c0_20, %c16] : memref<16x128xf32, #tpu.memory_space<vmem>>, vector<16x16xf32>
    tpu.vector_store %arg7[%c0_20, %c16], %41 {strides = array<i32>} : memref<16x128xf32, #tpu.memory_space<vmem>>, vector<16x16xf32>,
    %43 = vector.extract_strided_slice %6 {offsets = [0, 32], sizes = [16, 16], strides = [1, 1]} : vector<16x128xbf16> to vector<16x16xbf16>
    %44 = vector.extract_strided_slice %7 {offsets = [0, 32], sizes = [16, 16], strides = [1, 1]} : vector<16x128xbf16> to vector<16x16xbf16>
    %45 = vector.extract_strided_slice %8 {offsets = [0, 32], sizes = [16, 16], strides = [1, 1]} : vector<16x128xbf16> to vector<16x16xbf16>
    %cst_21 = arith.constant dense<0.000000e+00> : vector<16x16xf32>
    %46 = tpu.matmul %43, %44, %cst_21 {dimension_numbers = #tpu.dot_dimension_numbers<[1], [1], [0], [0], [0, 0, 1, 0], [], []>} : vector<16x16xbf16>, vector<16x16xbf16>, vector<16x16xf32> -> vector<16x16xf32>
    %cst_22 = arith.constant dense<0xFF800000> : vector<16xf32>
    %47 = vector.multi_reduction <maximumf>, %46, %cst_22 [1] : vector<16x16xf32> to vector<16xf32>
    %48 = vector.shape_cast %47 : vector<16xf32> to vector<16x1xf32>
    %49 = vector.broadcast %48 : vector<16x1xf32> to vector<16x16xf32>
    %50 = arith.subf %46, %49 : vector<16x16xf32>
    %51 = math.exp %50 : vector<16x16xf32>
    %cst_23 = arith.constant dense<0.000000e+00> : vector<16xf32>
    %52 = vector.multi_reduction <add>, %51, %cst_23 [1] : vector<16x16xf32> to vector<16xf32>
    %53 = vector.shape_cast %52 : vector<16xf32> to vector<16x1xf32>
    %54 = tpu.reciprocal %53 {approx = true} : vector<16x1xf32> -> vector<16x1xf32>
    %55 = vector.broadcast %54 : vector<16x1xf32> to vector<16x16xf32>
    %56 = arith.mulf %51, %55 : vector<16x16xf32>
    %57 = arith.truncf %56 : vector<16x16xf32> to vector<16x16xbf16>
    %cst_24 = arith.constant dense<0.000000e+00> : vector<16x16xf32>
    %58 = tpu.matmul %57, %45, %cst_24 {dimension_numbers = #tpu.dot_dimension_numbers<[1], [0], [0], [1], [0, 0, 1, 1], [], []>} : vector<16x16xbf16>, vector<16x16xbf16>, vector<16x16xf32> -> vector<16x16xf32>
    %c0_25 = arith.constant 0 : index
    %c32 = arith.constant 32 : index
    %59 = vector.load %arg7[%c0_25, %c32] : memref<16x128xf32, #tpu.memory_space<vmem>>, vector<16x16xf32>
    tpu.vector_store %arg7[%c0_25, %c32], %58 {strides = array<i32>} : memref<16x128xf32, #tpu.memory_space<vmem>>, vector<16x16xf32>,
    %60 = vector.extract_strided_slice %6 {offsets = [0, 48], sizes = [16, 16], strides = [1, 1]} : vector<16x128xbf16> to vector<16x16xbf16>
    %61 = vector.extract_strided_slice %7 {offsets = [0, 48], sizes = [16, 16], strides = [1, 1]} : vector<16x128xbf16> to vector<16x16xbf16>
    %62 = vector.extract_strided_slice %8 {offsets = [0, 48], sizes = [16, 16], strides = [1, 1]} : vector<16x128xbf16> to vector<16x16xbf16>
    %cst_26 = arith.constant dense<0.000000e+00> : vector<16x16xf32>
    %63 = tpu.matmul %60, %61, %cst_26 {dimension_numbers = #tpu.dot_dimension_numbers<[1], [1], [0], [0], [0, 0, 1, 0], [], []>} : vector<16x16xbf16>, vector<16x16xbf16>, vector<16x16xf32> -> vector<16x16xf32>
    %cst_27 = arith.constant dense<0xFF800000> : vector<16xf32>
    %64 = vector.multi_reduction <maximumf>, %63, %cst_27 [1] : vector<16x16xf32> to vector<16xf32>
    %65 = vector.shape_cast %64 : vector<16xf32> to vector<16x1xf32>
    %66 = vector.broadcast %65 : vector<16x1xf32> to vector<16x16xf32>
    %67 = arith.subf %63, %66 : vector<16x16xf32>
    %68 = math.exp %67 : vector<16x16xf32>
    %cst_28 = arith.constant dense<0.000000e+00> : vector<16xf32>
    %69 = vector.multi_reduction <add>, %68, %cst_28 [1] : vector<16x16xf32> to vector<16xf32>
    %70 = vector.shape_cast %69 : vector<16xf32> to vector<16x1xf32>
    %71 = tpu.reciprocal %70 {approx = true} : vector<16x1xf32> -> vector<16x1xf32>
    %72 = vector.broadcast %71 : vector<16x1xf32> to vector<16x16xf32>
    %73 = arith.mulf %68, %72 : vector<16x16xf32>
    %74 = arith.truncf %73 : vector<16x16xf32> to vector<16x16xbf16>
    %cst_29 = arith.constant dense<0.000000e+00> : vector<16x16xf32>
    %75 = tpu.matmul %74, %62, %cst_29 {dimension_numbers = #tpu.dot_dimension_numbers<[1], [0], [0], [1], [0, 0, 1, 1], [], []>} : vector<16x16xbf16>, vector<16x16xbf16>, vector<16x16xf32> -> vector<16x16xf32>
    %c0_30 = arith.constant 0 : index
    %c48 = arith.constant 48 : index
    %76 = vector.load %arg7[%c0_30, %c48] : memref<16x128xf32, #tpu.memory_space<vmem>>, vector<16x16xf32>
    tpu.vector_store %arg7[%c0_30, %c48], %75 {strides = array<i32>} : memref<16x128xf32, #tpu.memory_space<vmem>>, vector<16x16xf32>,
    %77 = vector.extract_strided_slice %6 {offsets = [0, 64], sizes = [16, 16], strides = [1, 1]} : vector<16x128xbf16> to vector<16x16xbf16>
    %78 = vector.extract_strided_slice %7 {offsets = [0, 64], sizes = [16, 16], strides = [1, 1]} : vector<16x128xbf16> to vector<16x16xbf16>
    %79 = vector.extract_strided_slice %8 {offsets = [0, 64], sizes = [16, 16], strides = [1, 1]} : vector<16x128xbf16> to vector<16x16xbf16>
    %cst_31 = arith.constant dense<0.000000e+00> : vector<16x16xf32>
    %80 = tpu.matmul %77, %78, %cst_31 {dimension_numbers = #tpu.dot_dimension_numbers<[1], [1], [0], [0], [0, 0, 1, 0], [], []>} : vector<16x16xbf16>, vector<16x16xbf16>, vector<16x16xf32> -> vector<16x16xf32>
    %cst_32 = arith.constant dense<0xFF800000> : vector<16xf32>
    %81 = vector.multi_reduction <maximumf>, %80, %cst_32 [1] : vector<16x16xf32> to vector<16xf32>
    %82 = vector.shape_cast %81 : vector<16xf32> to vector<16x1xf32>
    %83 = vector.broadcast %82 : vector<16x1xf32> to vector<16x16xf32>
    %84 = arith.subf %80, %83 : vector<16x16xf32>
    %85 = math.exp %84 : vector<16x16xf32>
    %cst_33 = arith.constant dense<0.000000e+00> : vector<16xf32>
    %86 = vector.multi_reduction <add>, %85, %cst_33 [1] : vector<16x16xf32> to vector<16xf32>
    %87 = vector.shape_cast %86 : vector<16xf32> to vector<16x1xf32>
    %88 = tpu.reciprocal %87 {approx = true} : vector<16x1xf32> -> vector<16x1xf32>
    %89 = vector.broadcast %88 : vector<16x1xf32> to vector<16x16xf32>
    %90 = arith.mulf %85, %89 : vector<16x16xf32>
    %91 = arith.truncf %90 : vector<16x16xf32> to vector<16x16xbf16>
    %cst_34 = arith.constant dense<0.000000e+00> : vector<16x16xf32>
    %92 = tpu.matmul %91, %79, %cst_34 {dimension_numbers = #tpu.dot_dimension_numbers<[1], [0], [0], [1], [0, 0, 1, 1], [], []>} : vector<16x16xbf16>, vector<16x16xbf16>, vector<16x16xf32> -> vector<16x16xf32>
    %c0_35 = arith.constant 0 : index
    %c64 = arith.constant 64 : index
    %93 = vector.load %arg7[%c0_35, %c64] : memref<16x128xf32, #tpu.memory_space<vmem>>, vector<16x16xf32>
    tpu.vector_store %arg7[%c0_35, %c64], %92 {strides = array<i32>} : memref<16x128xf32, #tpu.memory_space<vmem>>, vector<16x16xf32>,
    %94 = vector.extract_strided_slice %6 {offsets = [0, 80], sizes = [16, 16], strides = [1, 1]} : vector<16x128xbf16> to vector<16x16xbf16>
    %95 = vector.extract_strided_slice %7 {offsets = [0, 80], sizes = [16, 16], strides = [1, 1]} : vector<16x128xbf16> to vector<16x16xbf16>
    %96 = vector.extract_strided_slice %8 {offsets = [0, 80], sizes = [16, 16], strides = [1, 1]} : vector<16x128xbf16> to vector<16x16xbf16>
    %cst_36 = arith.constant dense<0.000000e+00> : vector<16x16xf32>
    %97 = tpu.matmul %94, %95, %cst_36 {dimension_numbers = #tpu.dot_dimension_numbers<[1], [1], [0], [0], [0, 0, 1, 0], [], []>} : vector<16x16xbf16>, vector<16x16xbf16>, vector<16x16xf32> -> vector<16x16xf32>
    %cst_37 = arith.constant dense<0xFF800000> : vector<16xf32>
    %98 = vector.multi_reduction <maximumf>, %97, %cst_37 [1] : vector<16x16xf32> to vector<16xf32>
    %99 = vector.shape_cast %98 : vector<16xf32> to vector<16x1xf32>
    %100 = vector.broadcast %99 : vector<16x1xf32> to vector<16x16xf32>
    %101 = arith.subf %97, %100 : vector<16x16xf32>
    %102 = math.exp %101 : vector<16x16xf32>
    %cst_38 = arith.constant dense<0.000000e+00> : vector<16xf32>
    %103 = vector.multi_reduction <add>, %102, %cst_38 [1] : vector<16x16xf32> to vector<16xf32>
    %104 = vector.shape_cast %103 : vector<16xf32> to vector<16x1xf32>
    %105 = tpu.reciprocal %104 {approx = true} : vector<16x1xf32> -> vector<16x1xf32>
    %106 = vector.broadcast %105 : vector<16x1xf32> to vector<16x16xf32>
    %107 = arith.mulf %102, %106 : vector<16x16xf32>
    %108 = arith.truncf %107 : vector<16x16xf32> to vector<16x16xbf16>
    %cst_39 = arith.constant dense<0.000000e+00> : vector<16x16xf32>
    %109 = tpu.matmul %108, %96, %cst_39 {dimension_numbers = #tpu.dot_dimension_numbers<[1], [0], [0], [1], [0, 0, 1, 1], [], []>} : vector<16x16xbf16>, vector<16x16xbf16>, vector<16x16xf32> -> vector<16x16xf32>
    %c0_40 = arith.constant 0 : index
    %c80 = arith.constant 80 : index
    %110 = vector.load %arg7[%c0_40, %c80] : memref<16x128xf32, #tpu.memory_space<vmem>>, vector<16x16xf32>
    tpu.vector_store %arg7[%c0_40, %c80], %109 {strides = array<i32>} : memref<16x128xf32, #tpu.memory_space<vmem>>, vector<16x16xf32>,
    %111 = vector.extract_strided_slice %6 {offsets = [0, 96], sizes = [16, 16], strides = [1, 1]} : vector<16x128xbf16> to vector<16x16xbf16>
    %112 = vector.extract_strided_slice %7 {offsets = [0, 96], sizes = [16, 16], strides = [1, 1]} : vector<16x128xbf16> to vector<16x16xbf16>
    %113 = vector.extract_strided_slice %8 {offsets = [0, 96], sizes = [16, 16], strides = [1, 1]} : vector<16x128xbf16> to vector<16x16xbf16>
    %cst_41 = arith.constant dense<0.000000e+00> : vector<16x16xf32>
    %114 = tpu.matmul %111, %112, %cst_41 {dimension_numbers = #tpu.dot_dimension_numbers<[1], [1], [0], [0], [0, 0, 1, 0], [], []>} : vector<16x16xbf16>, vector<16x16xbf16>, vector<16x16xf32> -> vector<16x16xf32>
    %cst_42 = arith.constant dense<0xFF800000> : vector<16xf32>
    %115 = vector.multi_reduction <maximumf>, %114, %cst_42 [1] : vector<16x16xf32> to vector<16xf32>
    %116 = vector.shape_cast %115 : vector<16xf32> to vector<16x1xf32>
    %117 = vector.broadcast %116 : vector<16x1xf32> to vector<16x16xf32>
    %118 = arith.subf %114, %117 : vector<16x16xf32>
    %119 = math.exp %118 : vector<16x16xf32>
    %cst_43 = arith.constant dense<0.000000e+00> : vector<16xf32>
    %120 = vector.multi_reduction <add>, %119, %cst_43 [1] : vector<16x16xf32> to vector<16xf32>
    %121 = vector.shape_cast %120 : vector<16xf32> to vector<16x1xf32>
    %122 = tpu.reciprocal %121 {approx = true} : vector<16x1xf32> -> vector<16x1xf32>
    %123 = vector.broadcast %122 : vector<16x1xf32> to vector<16x16xf32>
    %124 = arith.mulf %119, %123 : vector<16x16xf32>
    %125 = arith.truncf %124 : vector<16x16xf32> to vector<16x16xbf16>
    %cst_44 = arith.constant dense<0.000000e+00> : vector<16x16xf32>
    %126 = tpu.matmul %125, %113, %cst_44 {dimension_numbers = #tpu.dot_dimension_numbers<[1], [0], [0], [1], [0, 0, 1, 1], [], []>} : vector<16x16xbf16>, vector<16x16xbf16>, vector<16x16xf32> -> vector<16x16xf32>
    %c0_45 = arith.constant 0 : index
    %c96 = arith.constant 96 : index
    %127 = vector.load %arg7[%c0_45, %c96] : memref<16x128xf32, #tpu.memory_space<vmem>>, vector<16x16xf32>
    tpu.vector_store %arg7[%c0_45, %c96], %126 {strides = array<i32>} : memref<16x128xf32, #tpu.memory_space<vmem>>, vector<16x16xf32>,
    %128 = vector.extract_strided_slice %6 {offsets = [0, 112], sizes = [16, 16], strides = [1, 1]} : vector<16x128xbf16> to vector<16x16xbf16>
    %129 = vector.extract_strided_slice %7 {offsets = [0, 112], sizes = [16, 16], strides = [1, 1]} : vector<16x128xbf16> to vector<16x16xbf16>
    %130 = vector.extract_strided_slice %8 {offsets = [0, 112], sizes = [16, 16], strides = [1, 1]} : vector<16x128xbf16> to vector<16x16xbf16>
    %cst_46 = arith.constant dense<0.000000e+00> : vector<16x16xf32>
    %131 = tpu.matmul %128, %129, %cst_46 {dimension_numbers = #tpu.dot_dimension_numbers<[1], [1], [0], [0], [0, 0, 1, 0], [], []>} : vector<16x16xbf16>, vector<16x16xbf16>, vector<16x16xf32> -> vector<16x16xf32>
    %cst_47 = arith.constant dense<0xFF800000> : vector<16xf32>
    %132 = vector.multi_reduction <maximumf>, %131, %cst_47 [1] : vector<16x16xf32> to vector<16xf32>
    %133 = vector.shape_cast %132 : vector<16xf32> to vector<16x1xf32>
    %134 = vector.broadcast %133 : vector<16x1xf32> to vector<16x16xf32>
    %135 = arith.subf %131, %134 : vector<16x16xf32>
    %136 = math.exp %135 : vector<16x16xf32>
    %cst_48 = arith.constant dense<0.000000e+00> : vector<16xf32>
    %137 = vector.multi_reduction <add>, %136, %cst_48 [1] : vector<16x16xf32> to vector<16xf32>
    %138 = vector.shape_cast %137 : vector<16xf32> to vector<16x1xf32>
    %139 = tpu.reciprocal %138 {approx = true} : vector<16x1xf32> -> vector<16x1xf32>
    %140 = vector.broadcast %139 : vector<16x1xf32> to vector<16x16xf32>
    %141 = arith.mulf %136, %140 : vector<16x16xf32>
    %142 = arith.truncf %141 : vector<16x16xf32> to vector<16x16xbf16>
    %cst_49 = arith.constant dense<0.000000e+00> : vector<16x16xf32>
    %143 = tpu.matmul %142, %130, %cst_49 {dimension_numbers = #tpu.dot_dimension_numbers<[1], [0], [0], [1], [0, 0, 1, 1], [], []>} : vector<16x16xbf16>, vector<16x16xbf16>, vector<16x16xf32> -> vector<16x16xf32>
    %c0_50 = arith.constant 0 : index
    %c112 = arith.constant 112 : index
    %144 = vector.load %arg7[%c0_50, %c112] : memref<16x128xf32, #tpu.memory_space<vmem>>, vector<16x16xf32>
    tpu.vector_store %arg7[%c0_50, %c112], %143 {strides = array<i32>} : memref<16x128xf32, #tpu.memory_space<vmem>>, vector<16x16xf32>,
    %c0_51 = arith.constant 0 : index
    %c0_52 = arith.constant 0 : index
    %145 = vector.load %arg7[%c0_51, %c0_52] : memref<16x128xf32, #tpu.memory_space<vmem>>, vector<16x128xf32>
    %146 = arith.truncf %145 : vector<16x128xf32> to vector<16x128xbf16>
    %c0_53 = arith.constant 0 : index
    %c0_54 = arith.constant 0 : index
    %147 = vector.load %arg3[%c0_53, %c0_54] : memref<128x128xbf16, #tpu.memory_space<vmem>>, vector<128x128xbf16>
    %cst_55 = arith.constant dense<0.000000e+00> : vector<16x128xf32>
    %148 = tpu.matmul %146, %147, %cst_55 {dimension_numbers = #tpu.dot_dimension_numbers<[1], [0], [0], [1], [0, 0, 1, 1], [], []>} : vector<16x128xbf16>, vector<128x128xbf16>, vector<16x128xf32> -> vector<16x128xf32>
    %c0_56 = arith.constant 0 : index
    %c0_57 = arith.constant 0 : index
    %149 = vector.load %arg4[%c0_56, %c0_57] : memref<1x128xf32, #tpu.memory_space<vmem>>, vector<1x128xf32>
    %150 = vector.broadcast %149 : vector<1x128xf32> to vector<16x128xf32>
    %151 = arith.addf %148, %150 : vector<16x128xf32>
    %c0_58 = arith.constant 0 : index
    %c0_59 = arith.constant 0 : index
    %c0_60 = arith.constant 0 : index
    %152 = vector.load %arg5[%c0_58, %c0_59, %c0_60] : memref<1x16x128xf32, #tpu.memory_space<vmem>>, vector<1x16x128xf32>
    %153 = vector.shape_cast %152 : vector<1x16x128xf32> to vector<16x128xf32>
    %154 = vector.shape_cast %151 : vector<16x128xf32> to vector<1x16x128xf32>
    tpu.vector_store %arg5[%c0_58, %c0_59, %c0_60], %154 {strides = array<i32>} : memref<1x16x128xf32, #tpu.memory_space<vmem>>, vector<1x16x128xf32>,
    return
  }
  func.func @transform_0(%arg0: i32) -> (i32, i32, i32) {
    %c0_i32 = arith.constant 0 : i32
    %c0_i32_0 = arith.constant 0 : i32
    %c0_i32_1 = arith.constant 0 : i32
    return %arg0, %c0_i32, %c0_i32_0 : i32, i32, i32
  }
  func.func @transform_1(%arg0: i32) -> (i32, i32) {
    %c0_i32 = arith.constant 0 : i32
    %c0_i32_0 = arith.constant 0 : i32
    %c0_i32_1 = arith.constant 0 : i32
    return %c0_i32, %c0_i32_0 : i32, i32
  }
  func.func @transform_2(%arg0: i32) -> (i32, i32) {
    %c0_i32 = arith.constant 0 : i32
    %c0_i32_0 = arith.constant 0 : i32
    %c0_i32_1 = arith.constant 0 : i32
    return %c0_i32, %c0_i32_0 : i32, i32
  }
  func.func @transform_3(%arg0: i32) -> (i32, i32) {
    %c0_i32 = arith.constant 0 : i32
    %c0_i32_0 = arith.constant 0 : i32
    %c0_i32_1 = arith.constant 0 : i32
    return %c0_i32, %c0_i32_0 : i32, i32
  }
  func.func @transform_4(%arg0: i32) -> (i32, i32, i32) {
    %c0_i32 = arith.constant 0 : i32
    %c0_i32_0 = arith.constant 0 : i32
    %c0_i32_1 = arith.constant 0 : i32
    return %arg0, %c0_i32, %c0_i32_0 : i32, i32, i32
  }
}

</mosaic_0001>

<bundles_post_ra>
// kernel: attention_forward.1
= control target key start
LH: loop header
LB: loop body
LE: loop exit
PB: predicated region body
PF: predicated region fallthrough
CT: control target
= control target key end

     0   :  { %9 = vsyncpa [#allocation5], 0  ;;  %s2120_s0 = inlined_call_operand.vmem [shape: bf16[2,16,128], index: 0, kind: input, shape index: {}]   ;;  %s2121_s1 = inlined_call_operand.vmem [shape: bf16[128,384], index: 1, kind: input, shape index: {}]   ;;  %s2122_s2 = inlined_call_operand.vmem [shape: bf16[128,128], index: 2, kind: input, shape index: {}]   ;;  %s2123_s3 = inlined_call_operand.vmem [shape: f32[1,128], index: 3, kind: input, shape index: {}]   ;;  %s2124_s4 = inlined_call_operand.hbm [shape: f32[2,16,128], index: 4, kind: output, shape index: {}]  }
   0x1   :  { %11 = vsyncpa [#allocation5 + $0x1], 0  ;;  %s1632_s15 = smov 0   ;;  %s1634_s16 = smov 0  }
   0x2   :  { %s1636_s17 = smov 0   ;;  %s1638_s18 = smov 0  }
   0x3 LB: > { %s1653_s19 = sadd.s32 4294967295, %s1596_s18   ;;  %s1211_s20 = sadd.s32 4294967294, %s1596_s18   ;;  %s1596_s18 = sphi %s1638_s18, %s2130_s18   ;;  %s1592_s17 = sphi %s1636_s17, %s2129_s17   ;;  %s1588_s16 = sphi %s1634_s16, %s2128_s16   ;;  %s1584_s15 = sphi %s1632_s15, %s2127_s15  }
   0x4   : > { %s1657_s21 = sadd.s32 1, %s1596_s18   ;;  %s113_s22 = sadd.s32 1, %s1592_s17 }
   0x5   : > { %s110_s23 = ssub.s32 %s1596_s18, %s1657_s21  ;;  %p123_p0 = scmp.ne.s32.totalorder %s1592_s17, %s1588_s16 }
   0x6   : > { %p111_p1 = scmp.eq.s32.totalorder %s110_s23, 0  ;;  %p124_p2 = scmp.eq.s32.totalorder %s1653_s19, 1 }
   0x7   : > { %p129_p3 = scmp.ne.s32.totalorder %s1588_s16, %s1584_s15  ;;  %p130_p4 = scmp.eq.s32.totalorder %s1211_s20, 1 }
   0x8   : > { %s1668_s24 = scalar_select %p111_p1, %s1592_s17, %s113_s22  }
   0x9   : > { %p1670_p5 = por %p124_p2, %p123_p0  ;;  %p1674_p6 = por %p130_p4, %p129_p3 }
   0xa   : > { %p1214_p7 = scmp.ge.s32.totalorder %s1596_s18, 1  ;;  %p165_p8 = scmp.lt.s32.totalorder %s1596_s18, 3 }
   0xc   : > { %p166_p9 = pnand %p1214_p7, %p165_p8 }
   0xd   : > { %p191_p10 = scmp.lt.s32.totalorder (!%p166_p9), %s1653_s19, 1  ;;  %s1598_s23 = smov (!%p166_p9), 112  }
   0xe   : > { %169 = sbr.rel (%p166_p9) target bundleno = 1551 (0x60f), region = 36  ;;  %s1599_s28 = smov (!%p166_p9), 96  }
   0xf   : > { %s1600_s29 = smov (!%p166_p9), 80   ;;  %s1601_s30 = smov (!%p166_p9), 64  }
  0x10   : > { %s1603_s6 = smov (!%p166_p9), 48   ;;  %s1604_s7 = smov (!%p166_p9), 32  }
  0x11   : > { %s1420_s10 = sshll.u32 (!%p166_p9), %s1653_s19, 4 }
  0x13   : > { %v1308_v0 = vld [vmem:[%s2121_s1 + $0xa8] sm:$0xf]  ;;  %v1407_v1 = vld [vmem:[%s2121_s1 + $0xb0] sm:$0xf0]  ;;  %v1406_v2 = vld [vmem:[%s2121_s1 + $0xac] sm:$0xf] }
  0x14   : > { %v1309_v3 = vor.u32 %v1407_v1, %v1308_v0  ;;  %v1310_v4 = vld [vmem:[%s2121_s1 + $0xb4] sm:$0xf0]  ;;  %v1296_v5 = vld [vmem:[%s2121_s1 + $0x90] sm:$0xf]  ;;  %v1404_v6 = vld [vmem:[%s2121_s1 + $0x98] sm:$0xf0] }
  0x15   : > { %v1313_v7 = vor.u32 %v1406_v2, %v1310_v4  ;;  %v1403_v8 = vld [vmem:[%s2121_s1 + $0x94] sm:$0xf]  ;;  %v1298_v9 = vld [vmem:[%s2121_s1 + $0x9c] sm:$0xf0]  ;;  %v1297_v10 = vor.u32 %v1404_v6, %v1296_v5  ;;  %v1284_v12 = vld [vmem:[%s2121_s1 + $0x78] sm:$0xf] }
  0x16   : > { %365 = vmatpush.bf16.msra.mxu0 %v1309_v3  ;;  %v1301_v11 = vor.u32 %v1403_v8, %v1298_v9  ;;  %v1401_v13 = vld [vmem:[%s2121_s1 + $0x80] sm:$0xf0]  ;;  %v1400_v14 = vld [vmem:[%s2121_s1 + $0x7c] sm:$0xf]  ;;  %v1286_v15 = vld [vmem:[%s2121_s1 + $0x84] sm:$0xf0] }
  0x17   : > { %379 = vmatpush.bf16.msra.mxu1 %v1313_v7  ;;  %v1285_v16 = vor.u32 %v1401_v13, %v1284_v12  ;;  %v1289_v17 = vor.u32 %v1400_v14, %v1286_v15  ;;  %v1272_v18 = vld [vmem:[%s2121_s1 + $0x60] sm:$0xf]  ;;  %v1398_v19 = vld [vmem:[%s2121_s1 + $0x68] sm:$0xf0]  ;;  %v1397_v20 = vld [vmem:[%s2121_s1 + $0x64] sm:$0xf] }
  0x18   : > { %v1274_v21 = vld [vmem:[%s2121_s1 + $0x6c] sm:$0xf0]  ;;  %v1273_v22 = vor.u32 %v1398_v19, %v1272_v18  ;;  %v1408_v24 = vld [vmem:[%s2121_s1 + $0xb8] sm:$0xf0]  ;;  %v1304_v25 = vld [vmem:[%s2121_s1 + $0x98] sm:$0xf] }
  0x19   : > { %v1316_v23 = vld [vmem:[%s2121_s1 + $0xb0] sm:$0xf]  ;;  %v1277_v26 = vor.u32 %v1397_v20, %v1274_v21  ;;  %v1260_v27 = vld [vmem:[%s2121_s1 + $0x48] sm:$0xf]  ;;  %v1395_v28 = vld [vmem:[%s2121_s1 + $0x50] sm:$0xf0] }
  0x1a   : > { %366 = vmatpush.bf16.msra.mxu0 %v1297_v10  ;;  %v1317_v29 = vor.u32 %v1408_v24, %v1316_v23  ;;  %v1405_v30 = vld [vmem:[%s2121_s1 + $0xa0] sm:$0xf0]  ;;  %v1394_v31 = vld [vmem:[%s2121_s1 + $0x4c] sm:$0xf]  ;;  %v1262_v32 = vld [vmem:[%s2121_s1 + $0x54] sm:$0xf0]  ;;  %v1261_v34 = vor.u32 %v1395_v28, %v1260_v27 }
  0x1b   : > { %380 = vmatpush.bf16.msra.mxu1 %v1301_v11  ;;  %v1305_v33 = vor.u32 %v1405_v30, %v1304_v25  ;;  %v1292_v35 = vld [vmem:[%s2121_s1 + $0x80] sm:$0xf]  ;;  %v1402_v36 = vld [vmem:[%s2121_s1 + $0x88] sm:$0xf0]  ;;  %v1265_v37 = vor.u32 %v1394_v31, %v1262_v32  ;;  %v1248_v38 = vld [vmem:[%s2121_s1 + $0x30] sm:$0xf] }
  0x1c   : > { %393 = vmatpush.bf16.msra.mxu2 %v1317_v29  ;;  %v1392_v39 = vld [vmem:[%s2121_s1 + $0x38] sm:$0xf0]  ;;  %v1391_v40 = vld [vmem:[%s2121_s1 + $0x34] sm:$0xf]  ;;  %v1250_v41 = vld [vmem:[%s2121_s1 + $0x3c] sm:$0xf0]  ;;  %v1293_v42 = vor.u32 %v1402_v36, %v1292_v35 }
  0x1d   : > { %v1249_v43 = vor.u32 %v1392_v39, %v1248_v38  ;;  %v1280_v44 = vld [vmem:[%s2121_s1 + $0x68] sm:$0xf]  ;;  %v1399_v45 = vld [vmem:[%s2121_s1 + $0x70] sm:$0xf0]  ;;  %v1253_v46 = vor.u32 %v1391_v40, %v1250_v41  ;;  %v1236_v47 = vld [vmem:[%s2121_s1 + $0x18] sm:$0xf] }
  0x1e   : > { %367 = vmatpush.bf16.msra.mxu0 %v1285_v16  ;;  %v1389_v48 = vld [vmem:[%s2121_s1 + $0x20] sm:$0xf0]  ;;  %s192_s27 = scalar_select %p191_p10, %s1653_s19, 1  ;;  %v1388_v49 = vld [vmem:[%s2121_s1 + $0x1c] sm:$0xf]  ;;  %v1281_v51 = vor.u32 %v1399_v45, %v1280_v44  ;;  %vm431_vm0 = vcmask 130048  }
  0x1f   : > { %381 = vmatpush.bf16.msra.mxu1 %v1289_v17  ;;  %v1238_v50 = vld [vmem:[%s2121_s1 + $0x24] sm:$0xf0]  ;;  %v1237_v52 = vor.u32 %v1389_v48, %v1236_v47  ;;  %v1268_v53 = vld [vmem:[%s2121_s1 + $0x50] sm:$0xf]  ;;  %v1396_v54 = vld [vmem:[%s2121_s1 + $0x58] sm:$0xf0] }
  0x20   : > { %394 = vmatpush.bf16.msra.mxu2 %v1305_v33  ;;  %v1241_v55 = vor.u32 %v1388_v49, %v1238_v50  ;;  %v1224_v56 = vld [vmem:[%s2121_s1] sm:$0xf]  ;;  %v1386_v57 = vld [vmem:[%s2121_s1 + $0x8] sm:$0xf0]  ;;  %s1383_s14 = sshll.u32 %s192_s27, 3  ;;  %v1269_v60 = vor.u32 %v1396_v54, %v1268_v53  ;;  %vm575_vm1 = vcmask 261248  }
  0x21   : > { %v1385_v58 = vld [vmem:[%s2121_s1 + $0x4] sm:$0xf]  ;;  %v1226_v59 = vld [vmem:[%s2121_s1 + $0xc] sm:$0xf0]  ;;  %v1225_v61 = vor.u32 %v1386_v57, %v1224_v56  ;;  %s195_s5 = scalar_lea.vmem %s2120_s0, %s1383_s14  ;;  %v1256_v62 = vld [vmem:[%s2121_s1 + $0x38] sm:$0xf]  ;;  %s1145_s14 = scalar_lea.hbm %s2124_s4, %s1420_s10 }
  0x22   : > { %368 = vmatpush.bf16.msra.mxu0 %v1273_v22  ;;  %v1393_v63 = vld [vmem:[%s2121_s1 + $0x40] sm:$0xf0]  ;;  %v1229_v0 = vor.u32 %v1385_v58, %v1226_v59  ;;  %v1244_v3 = vld [vmem:[%s2121_s1 + $0x20] sm:$0xf]  ;;  %v1390_v4 = vld [vmem:[%s2121_s1 + $0x28] sm:$0xf0] }
  0x23   : > { %382 = vmatpush.bf16.msra.mxu1 %v1277_v26  ;;  %v1384_v1 = vld [vmem:[%s195_s5] sm:$0xff]  ;;  %v1257_v2 = vor.u32 %v1393_v63, %v1256_v62  ;;  %v1245_v5 = vor.u32 %v1390_v4, %v1244_v3  ;;  %v1232_v6 = vld [vmem:[%s2121_s1 + $0x8] sm:$0xf]  ;;  %v1387_v7 = vld [vmem:[%s2121_s1 + $0x10] sm:$0xf0]  ;;  %s1602_s5 = smov 16  }
  0x24   : > { %395 = vmatpush.bf16.msra.mxu2 %v1293_v42  ;;  %v1233_v8 = vor.u32 %v1387_v7, %v1232_v6  ;;  %vm653_vm2 = vcmask 392448   ;;  %vm731_vm3 = vcmask 523648   ;;  %vm809_vm4 = vcmask 654848   ;;  %s1148_s22 = sshll.u32 %s1145_s14, 4  ;;  %s1149_s22 = int_to_ptr.hbm [resolvable:$true] %s1148_s22 }
  0x25   : > { %vm887_vm5 = vcmask 786048   ;;  %vm965_vm6 = vcmask 917248   ;;  %vm1043_vm7 = vcmask 1048448  }
  0x26   : > { %369 = vmatpush.bf16.msra.mxu0 %v1261_v34 }
  0x27   : > { %383 = vmatpush.bf16.msra.mxu1 %v1265_v37 }
  0x28   : > { %396 = vmatpush.bf16.msra.mxu2 %v1281_v51 }
  0x2a   : > { %370 = vmatpush.bf16.msra.mxu0 %v1249_v43 }
  0x2b   : > { %384 = vmatpush.bf16.msra.mxu1 %v1253_v46 }
  0x2c   : > { %397 = vmatpush.bf16.msra.mxu2 %v1269_v60 }
  0x2e   : > { %371 = vmatpush.bf16.msra.mxu0 %v1237_v52 }
  0x2f   : > { %385 = vmatpush.bf16.msra.mxu1 %v1241_v55 }
  0x30   : > { %398 = vmatpush.bf16.msra.mxu2 %v1257_v2 }
  0x32   : > { %372 = vmatpush.bf16.msra.mxu0 %v1225_v61 }
  0x33   : > { %386 = vmatpush.bf16.msra.mxu1 %v1229_v0 }
  0x34   : > { %399 = vmatpush.bf16.msra.mxu2 %v1245_v5 }
  0x35   : > { %373 = vmatmul.bf16.vlgmr.msra.gmra.mxu0 %v1384_v1 }
  0x36   : > { %387 = vmatmul.bf16.vlgmr.msra.gmra.mxu1 %v1384_v1 }
  0x38   : > { %400 = vmatpush.bf16.msra.mxu2 %v1233_v8 }
  0x3b   : > { %401 = vmatmul.bf16.vlgmr.msra.gmra.mxu2 %v1384_v1 }
  0xb2   : > { %v374_v9 = vpop.f32.mrf.mxu0 }
  0xb3   : > { %v388_v10 = vpop.f32.mrf.mxu1 }
  0xb4   : > { %v407_v11 = vpack.c.bf16 %v388_v10, %v374_v9 }
  0xb6   : > { %411 = vst [vmem:[#allocation2] sm:$0xff] %v407_v11 }
  0xba   : > { %v376_v12 = vpop.f32.mrf.mxu0 }
  0xbb   : > { %v390_v13 = vpop.f32.mrf.mxu1 }
  0xbc   : > { %v409_v14 = vpack.c.bf16 %v390_v13, %v376_v12 }
  0xbd   : > { %v1324_v15 = vld [vmem:[#allocation2 + $0x4] sm:$0xf]  ;;  %v1320_v20 = vld [vmem:[#allocation2] sm:$0xf] }
  0xbe   : > { %413 = vst [vmem:[#allocation2 + $0xc] sm:$0xff] %v409_v14  ;;  %v402_v22 = vpop.f32.mrf.mxu2 }
  0xbf   : > { %v408_v23 = vpack.c.bf16 %v402_v22, %v402_v22 }
  0xc1   : > { %412 = vst [vmem:[#allocation2 + $0x8] sm:$0xf] %v408_v23 }
  0xc5   : > { %v1410_v16 = vld [vmem:[#allocation2 + $0xc] sm:$0xf0]  ;;  %v1409_v19 = vld [vmem:[#allocation2 + $0x8] sm:$0xf0] }
  0xc6   : > { %v1829_v17 = vor.u32 %v1410_v16, %v1324_v15  ;;  %v1835_v21 = vor.u32 %v1409_v19, %v1320_v20  ;;  %v404_v24 = vpop.f32.mrf.mxu2 }
  0xc7   : > { %v410_v25 = vpack.c.bf16 %v404_v24, %v404_v24 }
  0xc8   : > { %502 = vrot.lane.b32.xlu2 %v1829_v17, %s1598_s23  ;;  %v436_v18 = vsel %vm431_vm0, %v1829_v17, 0  ;;  %v1329_v26 = vld [vmem:[#allocation2 + $0x8] sm:$0xf] }
  0xc9   : > { %445 = vmatpush.bf16.xpose.msra.mxu3 %v436_v18  ;;  %414 = vst [vmem:[#allocation2 + $0x14] sm:$0xf] %v410_v25 }
  0xd0   : > { %500 = vrot.lane.b32.xlu2 %v1835_v21, %s1598_s23  ;;  %1326 = vmatmul.msk.bf16.vlgmr.msra.gmra.mxu3 %vm431_vm0, %v1835_v21  ;;  %v1411_v27 = vld [vmem:[#allocation2 + $0x10] sm:$0xf0] }
  0xd1   : > { %v1851_v28 = vor.u32 %v1411_v27, %v1329_v26 }
  0xd3   : > { %491 = vmatpush.bf16.msrb.mxu3 %v1851_v28 }
  0xd8   : > { %578 = vrot.lane.b32.xlu2 %v1835_v21, %s1599_s28 }
  0xe0   : > { %656 = vrot.lane.b32.xlu2 %v1835_v21, %s1600_s29 }
  0xe8   : > { %736 = vrot.lane.b32.xlu2 %v1829_v17, %s1601_s30 }
  0xf0   : > { %734 = vrot.lane.b32.xlu2 %v1835_v21, %s1601_s30 }
  0xf8   : > { %970 = vrot.lane.b32.xlu2 %v1829_v17, %s1602_s5 }
 0x122   : > { %v503_v29 = vpop.permute.xlu2 %502 }
 0x123   : > { %v508_v30 = vsel %vm431_vm0, %v503_v29, 0 }
 0x124   : > { %517 = vmatpush.bf16.xpose.msra.mxu3 %v508_v30 }
 0x12a   : > { %v1855_v31 = vpop.permute.xlu2 %500 }
 0x132   : > { %v579_v32 = vpop.permute.xlu2 %578 }
 0x13a   : > { %v1857_v33 = vpop.permute.xlu2 %656 }
 0x142   : > { %v737_v34 = vpop.permute.xlu2 %736 }
 0x143   : > { %v742_v35 = vsel %vm431_vm0, %v737_v34, 0 }
 0x144   : > { %751 = vmatpush.bf16.xpose.msrb.mxu1 %v742_v35 }
 0x14a   : > { %v735_v36 = vpop.permute.xlu2 %734 }
 0x14b   : > { %1338 = vmatmul.msk.bf16.vlgmr.msrb.gmra.mxu1 %vm431_vm0, %v735_v36 }
 0x152   : > { %v971_v11 = vpop.permute.xlu2 %970 }
 0x153   : > { %v447_v37 = vpop.f32.mrf.mxu3  ;;  %v976_v12 = vsel %vm431_vm0, %v971_v11, 0 }
 0x154   : > { %v452_v38 = vsel %vm431_vm0, %v447_v37, -inf }
 0x155   : > { %453 = vmax.xlane.f32.xlu0 %v452_v38 }
 0x15b   : > { %v449_v39 = vpop.f32.mrf.mxu3 }
 0x15c   : > { %v455_v40 = vsel %vm431_vm0, %v449_v39, -inf }
 0x15d   : > { %456 = vmax.xlane.f32.xlu0 %v455_v40 }
 0x171   : > { %580 = vrot.lane.b32.xlu0 %v1829_v17, %s1599_s28 }
 0x179   : > { %814 = vrot.lane.b32.xlu0 %v1829_v17, %s1603_s6 }
 0x181   : > { %892 = vrot.lane.b32.xlu0 %v1829_v17, %s1604_s7 }
 0x189   : > { %968 = vrot.lane.b32.xlu0 %v1835_v21, %s1602_s5 }
 0x1c8   : > { %v454_v41 = vpop.xlane.xlu0 %453  ;;  %v1882_v56 = vpop.f32.mrf.mxu1 }
 0x1c9   : > { %v458_v42 = vsub.f32 %v447_v37, %v454_v41  ;;  %v758_v13 = vsel %vm431_vm0, %v1882_v56, -inf }
 0x1cb   : > { %v460_v43 = vmul.f32 1.442695, %v458_v42 }
 0x1cd   : > { %1470 = vpow2.f32 %v460_v43 }
 0x1d0   : > { %v457_v44 = vpop.xlane.xlu0 %456  ;;  %v1884_v57 = vpop.f32.mrf.mxu1 }
 0x1d1   : > { %v459_v45 = vsub.f32 %v449_v39, %v457_v44  ;;  %v761_v58 = vsel %vm431_vm0, %v1884_v57, -inf }
 0x1d3   : > { %v1471_v46 = vpop.eup %1470  ;;  %v462_v47 = vmul.f32 1.442695, %v459_v45 }
 0x1d4   : > { %v464_v48 = vsel %vm431_vm0, %v1471_v46, 0.0 }
 0x1d5   : > { %1472 = vpow2.f32 %v462_v47  ;;  %465 = vadd.xlane.f32.xlu1 %v464_v48 }
 0x1db   : > { %v1473_v49 = vpop.eup %1472 }
 0x1dc   : > { %v467_v50 = vsel %vm431_vm0, %v1473_v49, 0.0 }
 0x1dd   : > { %468 = vadd.xlane.f32.xlu1 %v467_v50 }
 0x1e3   : > { %v581_v51 = vpop.permute.xlu0 %580 }
 0x1e4   : > { %v586_v52 = vsel %vm431_vm0, %v581_v51, 0 }
 0x1e5   : > { %595 = vmatpush.bf16.xpose.msrb.mxu2 %v586_v52 }
 0x1eb   : > { %v815_v53 = vpop.permute.xlu0 %814 }
 0x1ec   : > { %1334 = vmatmul.msk.bf16.vlgmr.msrb.gmra.mxu2 %vm431_vm0, %v579_v32  ;;  %v820_v4 = vsel %vm431_vm0, %v815_v53, 0 }
 0x1f3   : > { %v893_v54 = vpop.permute.xlu0 %892 }
 0x1f4   : > { %v898_v55 = vsel %vm431_vm0, %v893_v54, 0 }
 0x1f5   : > { %907 = vmatpush.bf16.xpose.msra.mxu1 %v898_v55 }
 0x1f6   : > { %658 = vrot.lane.b32.xlu1 %v1829_v17, %s1600_s29 }
 0x1fb   : > { %v969_v14 = vpop.permute.xlu0 %968 }
 0x1fe   : > { %812 = vrot.lane.b32.xlu1 %v1835_v21, %s1603_s6 }
 0x206   : > { %890 = vrot.lane.b32.xlu1 %v1835_v21, %s1604_s7 }
 0x230   : > { %762 = vmax.xlane.f32.xlu1 %v761_v58 }
 0x248   : > { %v466_v59 = vpop.xlane.xlu1 %465 }
 0x249   : > { %1474 = vrcp.f32 %v466_v59 }
 0x24f   : > { %v1475_v61 = vpop.eup %1474 }
 0x250   : > { %v469_v60 = vpop.xlane.xlu1 %468  ;;  %v472_v63 = vmul.f32 %v1475_v61, %v1471_v46 }
 0x251   : > { %1476 = vrcp.f32 %v469_v60 }
 0x257   : > { %v1477_v62 = vpop.eup %1476 }
 0x258   : > { %v473_v0 = vmul.f32 %v1477_v62, %v1473_v49 }
 0x25a   : > { %v474_v1 = vpack.c.bf16 %v473_v0, %v472_v63 }
 0x25c   : > { %1331 = vmatmul.msk.bf16.vlgmr.msrb.gmra.mxu3 %vm431_vm0, %v474_v1 }
 0x268   : > { %v659_v2 = vpop.permute.xlu1 %658 }
 0x269   : > { %v664_v3 = vsel %vm431_vm0, %v659_v2, 0 }
 0x26a   : > { %673 = vmatpush.bf16.xpose.msrb.mxu3 %v664_v3 }
 0x26c   : > { %1332 = vmatmul.msk.bf16.vlgmr.msra.gmra.mxu3 %vm431_vm0, %v1855_v31 }
 0x26f   : > { %v597_v5 = vpop.f32.mrf.mxu2 }
 0x270   : > { %v813_v6 = vpop.permute.xlu1 %812  ;;  %v602_v7 = vsel %vm431_vm0, %v597_v5, -inf }
 0x271   : > { %603 = vmax.xlane.f32.xlu0 %v602_v7 }
 0x272   : > { %829 = vmatpush.bf16.xpose.msra.mxu3 %v820_v4 }
 0x277   : > { %v599_v8 = vpop.f32.mrf.mxu2 }
 0x278   : > { %v891_v9 = vpop.permute.xlu1 %890  ;;  %v605_v10 = vsel %vm431_vm0, %v599_v8, -inf }
 0x279   : > { %606 = vmax.xlane.f32.xlu2 %v605_v10  ;;  %1342 = vmatmul.msk.bf16.vlgmr.msra.gmra.mxu1 %vm431_vm0, %v891_v9 }
 0x27c   : > { %1336 = vmatmul.msk.bf16.vlgmr.msrb.gmra.mxu3 %vm431_vm0, %v1857_v33 }
 0x27d   : > { %985 = vmatpush.bf16.xpose.msrb.mxu3 %v976_v12 }
 0x281   : > { %759 = vmax.xlane.f32.xlu2 %v758_v13 }
 0x28c   : > { %1340 = vmatmul.msk.bf16.vlgmr.msra.gmra.mxu3 %vm431_vm0, %v813_v6 }
 0x29c   : > { %1344 = vmatmul.msk.bf16.vlgmr.msrb.gmra.mxu3 %vm431_vm0, %v969_v14 }
 0x2a3   : > { %v763_v39 = vpop.xlane.xlu1 %762 }
 0x2a4   : > { %v765_v40 = vsub.f32 %v1884_v57, %v763_v39 }
 0x2a6   : > { %v768_v43 = vmul.f32 1.442695, %v765_v40 }
 0x2df   : > { %v493_v15 = vpop.f32.mrf.mxu3 }
 0x2e0   : > { %498 = vst.msk [vmem:[#allocation3] sm:$0xff] %vm431_vm0, %v493_v15 }
 0x2e4   : > { %v604_v22 = vpop.xlane.xlu0 %603 }
 0x2e5   : > { %v608_v23 = vsub.f32 %v597_v5, %v604_v22 }
 0x2e7   : > { %v495_v16 = vpop.f32.mrf.mxu3  ;;  %v610_v29 = vmul.f32 1.442695, %v608_v23 }
 0x2e8   : > { %499 = vst.msk [vmem:[#allocation3 + $0x8] sm:$0xff] %vm431_vm0, %v495_v16 }
 0x2ec   : > { %v607_v17 = vpop.xlane.xlu2 %606 }
 0x2ed   : > { %v609_v18 = vsub.f32 %v599_v8, %v607_v17 }
 0x2ef   : > { %v612_v19 = vmul.f32 1.442695, %v609_v18  ;;  %v519_v20 = vpop.f32.mrf.mxu3 }
 0x2f0   : > { %v524_v21 = vsel %vm431_vm0, %v519_v20, -inf }
 0x2f1   : > { %1478 = vpow2.f32 %v612_v19  ;;  %525 = vmax.xlane.f32.xlu2 %v524_v21 }
 0x2f2   : > { %1480 = vpow2.f32 %v610_v29 }
 0x2f3   : > { %1482 = vpow2.f32 %v768_v43 }
 0x2f4   : > { %v760_v42 = vpop.xlane.xlu2 %759 }
 0x2f5   : > { %v764_v44 = vsub.f32 %v1882_v56, %v760_v42 }
 0x2f6   : > { %v1906_v24 = vpop.f32.mrf.mxu1 }
 0x2f7   : > { %v1908_v25 = vpop.eup %1478  ;;  %v914_v26 = vsel %vm431_vm0, %v1906_v24, -inf  ;;  %v521_v30 = vpop.f32.mrf.mxu3  ;;  %v766_v46 = vmul.f32 1.442695, %v764_v44 }
 0x2f8   : > { %915 = vmax.xlane.f32.xlu1 %v914_v26  ;;  %v617_v27 = vsel %vm431_vm0, %v1908_v25, 0.0  ;;  %v527_v32 = vsel %vm431_vm0, %v521_v30, -inf  ;;  %v1481_v34 = vpop.eup %1480 }
 0x2f9   : > { %618 = vadd.xlane.f32.xlu2 %v617_v27  ;;  %v614_v35 = vsel %vm431_vm0, %v1481_v34, 0.0  ;;  %1484 = vpow2.f32 %v766_v46  ;;  %v1939_v49 = vpop.eup %1482 }
 0x2fa   : > { %v773_v51 = vsel %vm431_vm0, %v1939_v49, 0.0 }
 0x2fe   : > { %v1914_v31 = vpop.f32.mrf.mxu1 }
 0x2ff   : > { %v917_v33 = vsel %vm431_vm0, %v1914_v31, -inf  ;;  %v1922_v36 = vpop.f32.mrf.mxu3  ;;  %v1945_v52 = vpop.eup %1484 }
 0x300   : > { %528 = vmax.xlane.f32.xlu1 %v527_v32  ;;  %918 = vmax.xlane.f32.xlu0 %v917_v33  ;;  %v680_v50 = vsel %vm431_vm0, %v1922_v36, -inf  ;;  %v770_v53 = vsel %vm431_vm0, %v1945_v52, 0.0 }
 0x307   : > { %v1928_v37 = vpop.f32.mrf.mxu3 }
 0x308   : > { %615 = vadd.xlane.f32.xlu0 %v614_v35  ;;  %v683_v54 = vsel %vm431_vm0, %v1928_v37, -inf }
 0x30f   : > { %v1930_v38 = vpop.f32.mrf.mxu3 }
 0x310   : > { %v836_v57 = vsel %vm431_vm0, %v1930_v38, -inf }
 0x311   : > { %703 = vrot.lane.b32.xlu2 %v1851_v28, %s1600_s29 }
 0x317   : > { %v833_v41 = vpop.f32.mrf.mxu3 }
 0x318   : > { %v839_v45 = vsel %vm431_vm0, %v833_v41, -inf }
 0x319   : > { %547 = vrot.lane.b32.xlu1 %v1851_v28, %s1598_s23 }
 0x31c   : > { %625 = vrot.lane.b32.xlu0 %v1851_v28, %s1599_s28 }
 0x31f   : > { %v1935_v47 = vpop.f32.mrf.mxu3 }
 0x320   : > { %v992_v48 = vsel %vm431_vm0, %v1935_v47, -inf }
 0x327   : > { %v1951_v55 = vpop.f32.mrf.mxu3 }
 0x328   : > { %v995_v56 = vsel %vm431_vm0, %v1951_v55, -inf }
 0x33a   : > { %840 = vmax.xlane.f32.xlu2 %v839_v45 }
 0x342   : > { %993 = vmax.xlane.f32.xlu2 %v992_v48 }
 0x343   : > { %681 = vmax.xlane.f32.xlu1 %v680_v50 }
 0x346   : > { %774 = vadd.xlane.f32.xlu0 %v773_v51 }
 0x34b   : > { %771 = vadd.xlane.f32.xlu1 %v770_v53 }
 0x34e   : > { %684 = vmax.xlane.f32.xlu0 %v683_v54 }
 0x353   : > { %996 = vmax.xlane.f32.xlu1 %v995_v56 }
 0x356   : > { %837 = vmax.xlane.f32.xlu0 %v836_v57 }
 0x364   : > { %v526_v58 = vpop.xlane.xlu2 %525 }
 0x365   : > { %v530_v59 = vsub.f32 %v519_v20, %v526_v58 }
 0x367   : > { %v532_v60 = vmul.f32 1.442695, %v530_v59 }
 0x369   : > { %1486 = vpow2.f32 %v532_v60 }
 0x36b   : > { %v1957_v61 = vpop.xlane.xlu1 %915 }
 0x36c   : > { %v619_v7 = vpop.xlane.xlu2 %618  ;;  %v920_v43 = vsub.f32 %v1906_v24, %v1957_v61 }
 0x36e   : > { %v922_v46 = vmul.f32 1.442695, %v920_v43 }
 0x36f   : > { %v1959_v62 = vpop.eup %1486 }
 0x370   : > { %v536_v63 = vsel %vm431_vm0, %v1959_v62, 0.0 }
 0x371   : > { %537 = vadd.xlane.f32.xlu0 %v536_v63 }
 0x373   : > { %v529_v0 = vpop.xlane.xlu1 %528  ;;  %v1963_v3 = vpop.xlane.xlu0 %918 }
 0x374   : > { %v531_v1 = vsub.f32 %v521_v30, %v529_v0  ;;  %v704_v11 = vpop.permute.xlu2 %703 }
 0x376   : > { %v534_v2 = vmul.f32 1.442695, %v531_v1 }
 0x378   : > { %1488 = vpow2.f32 %v534_v2 }
 0x37b   : > { %v616_v6 = vpop.xlane.xlu0 %615 }
 0x37c   : > { %1490 = vrcp.f32 %v616_v6 }
 0x37d   : > { %1492 = vrcp.f32 %v619_v7 }
 0x37e   : > { %v1965_v4 = vpop.eup %1488 }
 0x37f   : > { %v539_v5 = vsel %vm431_vm0, %v1965_v4, 0.0 }
 0x380   : > { %540 = vadd.xlane.f32.xlu2 %v539_v5 }
 0x382   : > { %v1491_v8 = vpop.eup %1490 }
 0x383   : > { %v1493_v9 = vpop.eup %1492  ;;  %v622_v12 = vmul.f32 %v1491_v8, %v1481_v34 }
 0x384   : > { %v623_v13 = vmul.f32 %v1493_v9, %v1908_v25 }
 0x386   : > { %v624_v15 = vpack.c.bf16 %v623_v13, %v622_v12 }
 0x38b   : > { %v548_v10 = vpop.permute.xlu1 %547 }
 0x38c   : > { %560 = vmatpush.bf16.msrb.mxu0 %v548_v10 }
 0x38e   : > { %v626_v14 = vpop.permute.xlu0 %625 }
 0x38f   : > { %638 = vmatpush.bf16.msra.mxu2 %v626_v14 }
 0x390   : > { %716 = vmatpush.bf16.msra.mxu0 %v704_v11 }
 0x392   : > { %1335 = vmatmul.msk.bf16.vlgmr.msra.gmra.mxu2 %vm431_vm0, %v624_v15 }
 0x3ad   : > { %v841_v16 = vpop.xlane.xlu2 %840 }
 0x3ae   : > { %v843_v17 = vsub.f32 %v833_v41, %v841_v16 }
 0x3b0   : > { %v846_v18 = vmul.f32 1.442695, %v843_v17 }
 0x3b2   : > { %1494 = vpow2.f32 %v846_v18 }
 0x3b5   : > { %v994_v53 = vpop.xlane.xlu2 %993 }
 0x3b6   : > { %v682_v19 = vpop.xlane.xlu1 %681  ;;  %v998_v54 = vsub.f32 %v1935_v47, %v994_v53 }
 0x3b7   : > { %v686_v20 = vsub.f32 %v1922_v36, %v682_v19 }
 0x3b8   : > { %v1972_v21 = vpop.eup %1494  ;;  %v1000_v57 = vmul.f32 1.442695, %v998_v54 }
 0x3b9   : > { %v688_v22 = vmul.f32 1.442695, %v686_v20  ;;  %v775_v23 = vpop.xlane.xlu0 %774  ;;  %v851_v26 = vsel %vm431_vm0, %v1972_v21, 0.0 }
 0x3ba   : > { %852 = vadd.xlane.f32.xlu1 %v851_v26 }
 0x3bb   : > { %1496 = vpow2.f32 %v688_v22 }
 0x3bc   : > { %1498 = vrcp.f32 %v775_v23 }
 0x3be   : > { %v772_v25 = vpop.xlane.xlu1 %771 }
 0x3bf   : > { %1500 = vrcp.f32 %v772_v25 }
 0x3c1   : > { %v1976_v27 = vpop.eup %1496  ;;  %v685_v29 = vpop.xlane.xlu0 %684 }
 0x3c2   : > { %v687_v30 = vsub.f32 %v1928_v37, %v685_v29  ;;  %v692_v32 = vsel %vm431_vm0, %v1976_v27, 0.0  ;;  %v1499_v33 = vpop.eup %1498 }
 0x3c3   : > { %693 = vadd.xlane.f32.xlu0 %v692_v32  ;;  %v1982_v36 = vmul.f32 %v1499_v33, %v1939_v49  ;;  %v921_v49 = vsub.f32 %v1914_v31, %v1963_v3 }
 0x3c4   : > { %v690_v34 = vmul.f32 1.442695, %v687_v30 }
 0x3c5   : > { %v1501_v35 = vpop.eup %1500  ;;  %v924_v24 = vmul.f32 1.442695, %v921_v49 }
 0x3c6   : > { %v1985_v39 = vmul.f32 %v1501_v35, %v1945_v52  ;;  %1502 = vpow2.f32 %v690_v34  ;;  %v997_v56 = vpop.xlane.xlu1 %996 }
 0x3c7   : > { %v999_v58 = vsub.f32 %v1951_v55, %v997_v56 }
 0x3c8   : > { %v780_v40 = vpack.c.bf16 %v1982_v36, %v1985_v39 }
 0x3c9   : > { %v838_v41 = vpop.xlane.xlu0 %837  ;;  %v1002_v60 = vmul.f32 1.442695, %v999_v58 }
 0x3ca   : > { %v842_v37 = vsub.f32 %v1930_v38, %v838_v41 }
 0x3cc   : > { %v1503_v42 = vpop.eup %1502  ;;  %v844_v44 = vmul.f32 1.442695, %v842_v37 }
 0x3cd   : > { %v695_v45 = vsel %vm431_vm0, %v1503_v42, 0.0 }
 0x3ce   : > { %1504 = vpow2.f32 %v844_v44  ;;  %696 = vadd.xlane.f32.xlu2 %v695_v45 }
 0x3cf   : > { %1506 = vpow2.f32 %v922_v46 }
 0x3d0   : > { %1508 = vpow2.f32 %v924_v24 }
 0x3d3   : > { %781 = vrot.lane.b32.xlu1 %v1851_v28, %s1601_s30 }
 0x3d4   : > { %v1995_v48 = vpop.eup %1504 }
 0x3d5   : > { %v848_v38 = vsel %vm431_vm0, %v1995_v48, 0.0  ;;  %v2003_v50 = vpop.eup %1506 }
 0x3d6   : > { %849 = vadd.xlane.f32.xlu2 %v848_v38  ;;  %v926_v51 = vsel %vm431_vm0, %v2003_v50, 0.0  ;;  %v2007_v52 = vpop.eup %1508 }
 0x3d7   : > { %859 = vrot.lane.b32.xlu0 %v1851_v28, %s1603_s6  ;;  %v929_v31 = vsel %vm431_vm0, %v2007_v52, 0.0 }
 0x3de   : > { %927 = vadd.xlane.f32.xlu2 %v926_v51 }
 0x3e4   : > { %v538_v59 = vpop.xlane.xlu0 %537 }
 0x3e5   : > { %1510 = vrcp.f32 %v538_v59 }
 0x3e6   : > { %930 = vadd.xlane.f32.xlu2 %v929_v31  ;;  %1512 = vpow2.f32 %v1000_v57 }
 0x3eb   : > { %v1511_v63 = vpop.eup %1510 }
 0x3ec   : > { %v1513_v0 = vpop.eup %1512  ;;  %v544_v2 = vmul.f32 %v1511_v63, %v1959_v62  ;;  %v1417_v63 = vld [vmem:[%s2122_s2 + $0x28] sm:$0xff] }
 0x3ed   : > { %v1004_v47 = vsel %vm431_vm0, %v1513_v0, 0.0 }
 0x3f3   : > { %v541_v61 = vpop.xlane.xlu2 %540 }
 0x3f4   : > { %1514 = vrcp.f32 %v541_v61  ;;  %v1418_v61 = vld [vmem:[%s2122_s2 + $0x30] sm:$0xff] }
 0x3f5   : > { %1516 = vpow2.f32 %v1002_v60  ;;  %v1419_v60 = vld [vmem:[%s2122_s2 + $0x38] sm:$0xff] }
 0x3f6   : > { %1117 = vmatpush.bf16.msrb.mxu1 %v1419_v60 }
 0x3fa   : > { %v1515_v1 = vpop.eup %1514  ;;  %1118 = vmatpush.bf16.msrb.mxu1 %v1418_v61 }
 0x3fb   : > { %v545_v3 = vmul.f32 %v1515_v1, %v1965_v4  ;;  %v1517_v5 = vpop.eup %1516  ;;  %v1415_v1 = vld [vmem:[%s2122_s2 + $0x18] sm:$0xff] }
 0x3fc   : > { %v1007_v55 = vsel %vm431_vm0, %v1517_v5, 0.0 }
 0x3fd   : > { %1005 = vadd.xlane.f32.xlu1 %v1004_v47  ;;  %v546_v6 = vpack.c.bf16 %v545_v3, %v544_v2  ;;  %v1414_v3 = vld [vmem:[%s2122_s2 + $0x10] sm:$0xff]  ;;  %v1413_v47 = vld [vmem:[%s2122_s2 + $0x8] sm:$0xff] }
 0x3fe   : > { %937 = vrot.lane.b32.xlu2 %v1851_v28, %s1604_s7  ;;  %1119 = vmatpush.bf16.msrb.mxu1 %v1417_v63 }
 0x3ff   : > { %1333 = vmatmul.msk.bf16.vlgmr.msrb.gmra.mxu0 %vm431_vm0, %v546_v6  ;;  %v1412_v6 = vld [vmem:[%s2122_s2] sm:$0xff] }
 0x401   : > { %1008 = vadd.xlane.f32.xlu0 %v1007_v55 }
 0x406   : > { %1015 = vrot.lane.b32.xlu2 %v1851_v28, %s1602_s5 }
 0x415   : > { %v640_v7 = vpop.f32.mrf.mxu2 }
 0x416   : > { %647 = vrot.lane.b32.xlu0 %v640_v7, %s1604_s7 }
 0x41d   : > { %v642_v62 = vpop.f32.mrf.mxu2 }
 0x41e   : > { %649 = vrot.lane.b32.xlu2 %v642_v62, %s1604_s7  ;;  %s188_s7 = sand.u32 1, %s1588_s16  }
 0x41f   : > { %s1215_s27 = sshll.u32 %s188_s7, 4 }
 0x420   : > { %s190_s11 = scalar_lea.vmem [#allocation4], %s1215_s27 }
 0x421   : > { %s1146_s20 = sshll.u32 %s190_s11, 4  ;;  %s1147_s20 = int_to_ptr.vmem [resolvable:$true] %s1146_s20 }
 0x42d   : > { %v853_v4 = vpop.xlane.xlu1 %852 }
 0x436   : > { %v694_v8 = vpop.xlane.xlu0 %693 }
 0x437   : > { %1518 = vrcp.f32 %v694_v8 }
 0x43d   : > { %v1519_v11 = vpop.eup %1518 }
 0x43e   : > { %v700_v13 = vmul.f32 %v1519_v11, %v1976_v27 }
 0x441   : > { %v697_v9 = vpop.xlane.xlu2 %696 }
 0x442   : > { %1520 = vrcp.f32 %v697_v9 }
 0x445   : > { %v782_v10 = vpop.permute.xlu1 %781 }
 0x446   : > { %794 = vmatpush.bf16.msrb.mxu2 %v782_v10 }
 0x448   : > { %v1521_v12 = vpop.eup %1520 }
 0x449   : > { %v701_v14 = vmul.f32 %v1521_v12, %v1503_v42  ;;  %1339 = vmatmul.msk.bf16.vlgmr.msrb.gmra.mxu2 %vm431_vm0, %v780_v40  ;;  %v850_v28 = vpop.xlane.xlu2 %849  ;;  %v860_v15 = vpop.permute.xlu0 %859  ;;  %v1469_v12 = vld [vmem:[%s2123_s3] ss:$0 sm:$0xff] }
 0x44a   : > { %872 = vmatpush.bf16.msrb.mxu0 %v860_v15  ;;  %1522 = vrcp.f32 %v850_v28 }
 0x44b   : > { %v702_v16 = vpack.c.bf16 %v701_v14, %v700_v13  ;;  %1524 = vrcp.f32 %v853_v4 }
 0x44d   : > { %1337 = vmatmul.msk.bf16.vlgmr.msra.gmra.mxu0 %vm431_vm0, %v702_v16 }
 0x450   : > { %v1523_v18 = vpop.eup %1522 }
 0x451   : > { %v928_v17 = vpop.xlane.xlu2 %927  ;;  %v1525_v19 = vpop.eup %1524  ;;  %v856_v20 = vmul.f32 %v1523_v18, %v1995_v48 }
 0x452   : > { %1526 = vrcp.f32 %v928_v17  ;;  %v857_v22 = vmul.f32 %v1525_v19, %v1972_v21 }
 0x454   : > { %v858_v26 = vpack.c.bf16 %v857_v22, %v856_v20 }
 0x458   : > { %v1527_v25 = vpop.eup %1526 }
 0x459   : > { %v931_v23 = vpop.xlane.xlu2 %930  ;;  %v934_v29 = vmul.f32 %v1527_v25, %v2003_v50 }
 0x45a   : > { %1528 = vrcp.f32 %v931_v23 }
 0x45d   : > { %1341 = vmatmul.msk.bf16.vlgmr.msrb.gmra.mxu0 %vm431_vm0, %v858_v26 }
 0x460   : > { %v1529_v27 = vpop.eup %1528 }
 0x461   : > { %v935_v30 = vmul.f32 %v1529_v27, %v2007_v52  ;;  %v938_v32 = vpop.permute.xlu2 %937 }
 0x462   : > { %950 = vmatpush.bf16.msra.mxu2 %v938_v32 }
 0x463   : > { %v936_v33 = vpack.c.bf16 %v935_v30, %v934_v29 }
 0x465   : > { %1343 = vmatmul.msk.bf16.vlgmr.msra.gmra.mxu2 %vm431_vm0, %v936_v33 }
 0x469   : > { %v1016_v34 = vpop.permute.xlu2 %1015 }
 0x46a   : > { %1028 = vmatpush.bf16.msra.mxu0 %v1016_v34 }
 0x470   : > { %v1006_v35 = vpop.xlane.xlu1 %1005 }
 0x471   : > { %1530 = vrcp.f32 %v1006_v35 }
 0x474   : > { %v1009_v21 = vpop.xlane.xlu0 %1008 }
 0x475   : > { %1532 = vrcp.f32 %v1009_v21 }
 0x477   : > { %v1531_v36 = vpop.eup %1530 }
 0x478   : > { %v1012_v40 = vmul.f32 %v1531_v36, %v1513_v0  ;;  %v650_v46 = vpop.permute.xlu2 %649  ;;  %v1416_v0 = vld [vmem:[%s2122_s2 + $0x20] sm:$0xff] }
 0x479   : > { %1120 = vmatpush.bf16.msrb.mxu1 %v1416_v0 }
 0x47b   : > { %v1533_v39 = vpop.eup %1532 }
 0x47c   : > { %v1013_v41 = vmul.f32 %v1533_v39, %v1517_v5  ;;  %v562_v37 = vpop.f32.mrf.mxu0 }
 0x47d   : > { %569 = vrot.lane.b32.xlu2 %v562_v37, %s1602_s5  ;;  %1121 = vmatpush.bf16.msrb.mxu1 %v1415_v1 }
 0x47e   : > { %v1014_v42 = vpack.c.bf16 %v1013_v41, %v1012_v40 }
 0x480   : > { %1345 = vmatmul.msk.bf16.vlgmr.msra.gmra.mxu0 %vm431_vm0, %v1014_v42 }
 0x481   : > { %1122 = vmatpush.bf16.msrb.mxu1 %v1414_v3 }
 0x484   : > { %v564_v43 = vpop.f32.mrf.mxu0 }
 0x485   : > { %1123 = vmatpush.bf16.msrb.mxu1 %v1413_v47 }
 0x488   : > { %v648_v24 = vpop.permute.xlu0 %647 }
 0x489   : > { %1124 = vmatpush.bf16.msrb.mxu1 %v1412_v6 }
 0x4ca   : > { %v718_v44 = vpop.f32.mrf.mxu0 }
 0x4cb   : > { %725 = vrot.lane.b32.xlu2 %v718_v44, %s1603_s6 }
 0x4cc   : > { %v796_v45 = vpop.f32.mrf.mxu2 }
 0x4cd   : > { %803 = vrot.lane.b32.xlu0 %v796_v45, %s1601_s30 }
 0x4d2   : > { %v720_v48 = vpop.f32.mrf.mxu0 }
 0x4d3   : > { %727 = vrot.lane.b32.xlu2 %v720_v48, %s1603_s6 }
 0x4d4   : > { %v798_v49 = vpop.f32.mrf.mxu2 }
 0x4d5   : > { %805 = vrot.lane.b32.xlu1 %v798_v49, %s1601_s30 }
 0x4d7   : > { %v570_v38 = vpop.permute.xlu2 %569 }
 0x4d8   : > { %576 = vst.msk [vmem:[#allocation3] sm:$0xff] %vm575_vm1, %v570_v38 }
 0x4d9   : > { %654 = vst.msk [vmem:[#allocation3] sm:$0xff] %vm653_vm2, %v648_v24 }
 0x4da   : > { %v874_v50 = vpop.f32.mrf.mxu0 }
 0x4db   : > { %881 = vrot.lane.b32.xlu2 %v874_v50, %s1600_s29 }
 0x4e2   : > { %v876_v51 = vpop.f32.mrf.mxu0 }
 0x4e3   : > { %883 = vrot.lane.b32.xlu0 %v876_v51, %s1600_s29 }
 0x4e8   : > { %v952_v52 = vpop.f32.mrf.mxu2 }
 0x4e9   : > { %959 = vrot.lane.b32.xlu1 %v952_v52, %s1599_s28 }
 0x4f0   : > { %v954_v31 = vpop.f32.mrf.mxu2 }
 0x4f1   : > { %571 = vrot.lane.b32.xlu1 %v564_v43, %s1602_s5  ;;  %961 = vrot.lane.b32.xlu2 %v954_v31, %s1599_s28  ;;  %s1548_s28 = sshra.s32 %s1149_s22, 4  ;;  %s1554_s5 = scalar_lea.hbm %s2124_s4, 32  ;;  %s1549_s28 = int_to_ptr.hbm [resolvable:$true] %s1548_s28 }
 0x4f2   : > { %s1550_s29 = scalar_lea.hbm %s1549_s28, 16  ;;  %p1555_p0 = scmp.lt.s32.totalorder %s1549_s28, %s2124_s4 }
 0x4f3   : > { %p1551_p11 = scmp.ne.s32.totalorder %s1549_s28, %s1550_s29  ;;  %p1556_p1 = scmp.lt.s32.totalorder %s1554_s5, %s1550_s29 }
 0x4f5   : > { %p1552_p12 = pnand %p1551_p11, %p1670_p5  ;;  %p1557_p2 = por %p1556_p1, %p1555_p0 }
 0x4f7   : > { %p1553_p13 = pneg %p1552_p12 }
 0x4f9   : > { %p1558_p3 = pnand %p1557_p2, %p1553_p13 }
 0x4fd   : > { %v1030_v53 = vpop.f32.mrf.mxu0 }
 0x4fe   : > { %1037 = vrot.lane.b32.xlu0 %v1030_v53, %s1598_s23 }
 0x505   : > { %v1032_v54 = vpop.f32.mrf.mxu0 }
 0x506   : > { %1039 = vrot.lane.b32.xlu1 %v1032_v54, %s1598_s23  ;;  %s1134_s23 = scalar_lea.sflag [#allocation5], %s188_s7 }
 0x525   : > { %v726_v56 = vpop.permute.xlu2 %725 }
 0x526   : > { %732 = vst.msk [vmem:[#allocation3] sm:$0xff] %vm731_vm3, %v726_v56 }
 0x52d   : > { %v728_v57 = vpop.permute.xlu2 %727 }
 0x535   : > { %v882_v59 = vpop.permute.xlu2 %881 }
 0x53f   : > { %v804_v58 = vpop.permute.xlu0 %803 }
 0x540   : > { %810 = vst.msk [vmem:[#allocation3] sm:$0xff] %vm809_vm4, %v804_v58 }
 0x541   : > { %888 = vst.msk [vmem:[#allocation3] sm:$0xff] %vm887_vm5, %v882_v59 }
 0x547   : > { %v806_v2 = vpop.permute.xlu1 %805 }
 0x54b   : > { %v962_v62 = vpop.permute.xlu2 %961 }
 0x555   : > { %v884_v7 = vpop.permute.xlu0 %883 }
 0x55b   : > { %v960_v5 = vpop.permute.xlu1 %959 }
 0x55c   : > { %966 = vst.msk [vmem:[#allocation3] sm:$0xff] %vm965_vm6, %v960_v5 }
 0x563   : > { %v572_v55 = vpop.permute.xlu1 %571 }
 0x564   : > { %577 = vst.msk [vmem:[#allocation3 + $0x8] sm:$0xff] %vm575_vm1, %v572_v55 }
 0x565   : > { %655 = vst.msk [vmem:[#allocation3 + $0x8] sm:$0xff] %vm653_vm2, %v650_v46 }
 0x566   : > { %733 = vst.msk [vmem:[#allocation3 + $0x8] sm:$0xff] %vm731_vm3, %v728_v57 }
 0x567   : > { %811 = vst.msk [vmem:[#allocation3 + $0x8] sm:$0xff] %vm809_vm4, %v806_v2 }
 0x568   : > { %889 = vst.msk [vmem:[#allocation3 + $0x8] sm:$0xff] %vm887_vm5, %v884_v7 }
 0x569   : > { %967 = vst.msk [vmem:[#allocation3 + $0x8] sm:$0xff] %vm965_vm6, %v962_v62 }
 0x570   : > { %v1038_v4 = vpop.permute.xlu0 %1037 }
 0x571   : > { %1044 = vst.msk [vmem:[#allocation3] sm:$0xff] %vm1043_vm7, %v1038_v4 }
 0x578   : > { %v1040_v8 = vpop.permute.xlu1 %1039  ;;  %v1046_v9 = vld [vmem:[#allocation3] sm:$0xff] }
 0x579   : > { %1045 = vst.msk [vmem:[#allocation3 + $0x8] sm:$0xff] %vm1043_vm7, %v1040_v8 }
 0x580   : > { %v1047_v10 = vld [vmem:[#allocation3 + $0x8] sm:$0xff] }
 0x581   : > { %v1048_v11 = vpack.c.bf16 %v1047_v10, %v1046_v9 }
 0x583   : > { %1125 = vmatmul.bf16.vlgmr.msrb.gmra.mxu1 %v1048_v11 }
 0x600   : > { %v1126_v13 = vpop.f32.mrf.mxu1 }
 0x601   : > { %v1127_v14 = vadd.f32 %v1469_v12, %v1126_v13 }
 0x603   : > { %1131 = vst [vmem:[%s190_s11] sm:$0xff] %v1127_v14 }
 0x608   : > { %v1128_v28 = vpop.f32.mrf.mxu1 }
 0x609   : > { %v1129_v15 = vadd.f32 %v1469_v12, %v1128_v28 }
 0x60b   : > { %1132 = vst [vmem:[%s190_s11 + $0x8] sm:$0xff] %v1129_v15 }
 0x60c   : > { %1561 = shalt.err (!%p1558_p3)
}
 0x60d   : > { %s1605_s7 = smov 128   ;;  %s1606_s8 = smov 8  }
 0x60e   : > { %1421 = dma.vmem_to_hbm [thread:$0]  (%p1670_p5), %s1147_s20, 256, %s1149_s22, %s1134_s23, %s1605_s7, %s1605_s7, %s1606_s8  }
 0x60f PF: > { %p1427_p4 = scmp.ge.s32.totalorder %s1596_s18, 2  ;;  %s1163_s9 = sand.u32 1, %s1584_s15  }
 0x610   : > { %s1164_s10 = scalar_lea.sflag [#allocation5], %s1163_s9 }
 0x611   : > { %p1424_p7 = pnand %p1427_p4, %p1674_p6 }
 0x613   : > { %p1425_p8 = pneg %p1424_p7 }
 0x615   : > { %1579 = dma.done.wait (%p1425_p8), %s1164_s10, 256  }
 0x616   : > { %1581 = vsyncadd (%p1425_p8), %s1164_s10, 4294967040  ;;  %p14_p9 = scmp.ge.s32.totalorder %s1657_s21, 4   ;;  %s2127_s15 = smov %s1588_s16 }
 0x617   : > { %s2128_s16 = smov %s1592_s17  ;;  %s2129_s17 = smov %s1668_s24 }
 0x618   : > { %s2130_s18 = smov %s1657_s21  ;;  %16 = sbr.rel (!%p14_p9) target bundleno = 3 (0x3), region = 71 }
 0x61d   :  { %1170 = vsyncpa [#allocation5], 1 }
 0x61e   :  { %1172 = vsyncpa [#allocation5 + $0x1], 1 }

</bundles_post_ra>
